<compile_context>
chip_gen: v7x
topology: tpu7x:2x2x1
jax: 0.10.0
libtpu: 0.0.40
codegen_flags: <defaults>
</compile_context>

<pallas_src>
import jax
import jax.numpy as jnp
from jax import lax
from jax.experimental import pallas as pl
from jax.experimental.pallas import tpu as pltpu

# ---- scaled-down model dims (BERTweet-base analog: 768 -> 64, 384 -> 32) ----
BATCH = 2
SEQ = 8
HIDDEN = 64        # bertweet hidden_size analog (768 in the real model)
LSTM_HID = 32      # per-direction LSTM hidden size (384 in the real model)
PROJ = 64          # output dim of self.W (768 in the real model)
OUT_DIM = 3        # classifier output_dim
VOCAB = 32


def _vmem_spec():
    return pl.BlockSpec(memory_space=pltpu.MemorySpace.VMEM)


# ---------------------------------------------------------------------------
# Fused kernel.
#   ids  : (S*B, 1) int32   time-major flat token ids (row r = t*B + b)
#   emb  : (V, H)           synthetic "bertweet" embedding table
#   wih  : (H, 8L)          input->gate weights, lanes [0:4L]=fwd, [4L:8L]=bwd
#                           gate lane order [i, f, o, g] per direction
#   bih  : (1, 8L)          combined (b_ih + b_hh) biases, both directions
#   whhf : (L, 4L)          fwd recurrent weights   (gate order [i,f,o,g])
#   whhb : (L, 4L)          bwd recurrent weights
#   wcat : (2L+H, PROJ)     W, rows pre-concatenated as [lstm_fwd|lstm_bwd|bert]
#   bw   : (1, PROJ)
#   wfc  : (PROJ, O), bfc : (1, O)
#   out  : (B, O)
# ---------------------------------------------------------------------------
def rcnn_kernel(ids_ref, emb_ref, wih_ref, bih_ref, whhf_ref, whhb_ref,
                wcat_ref, bw_ref, wfc_ref, bfc_ref, out_ref):
    B = out_ref.shape[0]
    SB = ids_ref.shape[0]
    S = SB // B
    V, H = emb_ref.shape
    L = whhf_ref.shape[0]
    G = 4 * L                                            # per-direction gate width

    # ---- fused "bertweet" embedding gather: one-hot @ table on the MXU ----
    ids = ids_ref[...]                                   # (S*B, 1) int32
    onehot = (ids == lax.broadcasted_iota(jnp.int32, (SB, V), 1)
              ).astype(jnp.float32)                      # (S*B, V)
    x = jnp.dot(onehot, emb_ref[...],
                preferred_element_type=jnp.float32)      # (S*B, H), time-major

    # ---- hoisted input projection for BOTH directions: one MXU matmul ----
    xw = (jnp.dot(x, wih_ref[...], preferred_element_type=jnp.float32)
          + bih_ref[...])                                # (S*B, 8L)

    whh_f = whhf_ref[...]                                # (L, 4L), loaded once
    whh_b = whhb_ref[...]

    def lstm_cell(gx, h, c, whh):
        # Gate lane order [i, f, o, g]: one sigmoid over 3L lanes, one tanh.
        gates = gx + jnp.dot(h, whh, preferred_element_type=jnp.float32)
        ifo = jax.nn.sigmoid(gates[:, :3 * L])
        g = jnp.tanh(gates[:, 3 * L:])
        c_new = ifo[:, L:2 * L] * c + ifo[:, :L] * g     # f*c + i*g
        h_new = ifo[:, 2 * L:] * jnp.tanh(c_new)         # o*tanh(c)
        return h_new, c_new

    h_f = jnp.zeros((B, L), jnp.float32)
    c_f = jnp.zeros((B, L), jnp.float32)
    h_b = jnp.zeros((B, L), jnp.float32)
    c_b = jnp.zeros((B, L), jnp.float32)
    h_f_steps = []
    h_b_steps = []
    # Statically unrolled: fwd walks time t, bwd walks time S-1-t.  The gate
    # input slices do not depend on h/c, so they sit off the critical path.
    for t in range(S):
        h_f, c_f = lstm_cell(xw[t * B:(t + 1) * B, :G], h_f, c_f, whh_f)
        h_b, c_b = lstm_cell(xw[(S - 1 - t) * B:(S - t) * B, G:],
                             h_b, c_b, whh_b)
        h_f_steps.append(h_f)
        h_b_steps.append(h_b)

    # Assemble once (registers -> one slab); no VMEM scratch, no masked stores.
    h_fwd = jnp.concatenate(h_f_steps, axis=0)           # (S*B, L) time-major
    h_bwd = jnp.concatenate(h_b_steps[::-1], axis=0)     # (S*B, L) time-major

    # Head: cat([lstm_fwd, lstm_bwd, bert]) @ W + b as ONE K = 2L+H = 128
    # lane-dense MXU matmul, then tanh.
    head = jnp.concatenate([h_fwd, h_bwd, x], axis=1)    # (S*B, 2L+H)
    z = jnp.tanh(jnp.dot(head, wcat_ref[...],
                         preferred_element_type=jnp.float32)
                 + bw_ref[...])                          # (S*B, PROJ)

    # max_pool1d over the sequence: rows are time-major (r = t*B + b), so the
    # pool is an unrolled elementwise max over the S row-blocks of size B.
    pooled = z[0:B, :]
    for t in range(1, S):
        pooled = jnp.maximum(pooled, z[t * B:(t + 1) * B, :])

    out_ref[...] = (jnp.dot(pooled, wfc_ref[...],
                            preferred_element_type=jnp.float32)
                    + bfc_ref[...])


# ---------------------------------------------------------------------------
# Parameter init (deterministic, synthetic) and forward wrapper.
# ---------------------------------------------------------------------------
def init_params(key):
    ks = jax.random.split(key, 9)
    s = 0.02
    L = LSTM_HID
    return {
        # synthetic "bertweet" embedding table (gathered inside the kernel)
        "emb": jax.random.normal(ks[0], (VOCAB, HIDDEN), jnp.float32) * s,
        # LSTM input->gate weights, pre-transposed, both directions on lanes:
        # [fwd i,f,o,g | bwd i,f,o,g].  NOTE: gate order differs from
        # PyTorch's [i,f,g,o]; real checkpoint weights would need a permute
        # + transpose when imported.
        "wih": jax.random.normal(ks[1], (HIDDEN, 8 * L), jnp.float32) * s,
        # combined (b_ih + b_hh) biases for both directions
        "bih": jax.random.normal(ks[2], (1, 8 * L), jnp.float32) * s,
        # per-direction recurrent weights (gate order [i,f,o,g])
        "whh_f": jax.random.normal(ks[3], (L, 4 * L), jnp.float32) * s,
        "whh_b": jax.random.normal(ks[4], (L, 4 * L), jnp.float32) * s,
        # W: Linear(2L + hidden -> PROJ), rows pre-concatenated in the torch
        # cat order [lstm_fwd(L), lstm_bwd(L), bert(H)]
        "wcat": jax.random.normal(ks[5], (2 * L + HIDDEN, PROJ),
                                  jnp.float32) * s,
        "bw": jax.random.normal(ks[6], (1, PROJ), jnp.float32) * s,
        # fc: Linear(PROJ -> OUT_DIM)
        "wfc": jax.random.normal(ks[7], (PROJ, OUT_DIM), jnp.float32) * s,
        "bfc": jax.random.normal(ks[8], (1, OUT_DIM), jnp.float32) * s,
    }


@jax.jit
def bertweet_rcnn_forward(params, input_ids, attention_mask, token_type_ids):
    # TODO(synk): the real pretrained BERTweet encoder (which consumes
    # attention_mask / token_type_ids) is not reproduced; a deterministic
    # embedding-table lookup fused into the kernel stands in for it.
    del attention_mask, token_type_ids
    B, S = input_ids.shape
    # Time-major flat ids (row r = t*B + b): 64 bytes of int32, fused under
    # jit into the same executable as the Pallas custom call.
    ids_tm = jnp.transpose(input_ids).reshape(S * B, 1).astype(jnp.int32)
    # At real BERTweet dims (H=768, L=384, big B*S) this would get a grid over
    # the B*S dimension (parallel on v7x's 2 TCs), bf16 weights and an explicit
    # vmem_limit; at toy dims the whole resident set is a few hundred KB.
    return pl.pallas_call(
        rcnn_kernel,
        out_shape=jax.ShapeDtypeStruct((B, OUT_DIM), jnp.float32),
        in_specs=[_vmem_spec()] * 10,
        out_specs=_vmem_spec(),
    )(ids_tm, params["emb"], params["wih"], params["bih"],
      params["whh_f"], params["whh_b"], params["wcat"], params["bw"],
      params["wfc"], params["bfc"])


if __name__ == "__main__":
    key = jax.random.PRNGKey(0)
    pkey, ikey = jax.random.split(key)
    params = init_params(pkey)

    input_ids = jax.random.randint(ikey, (BATCH, SEQ), 0, VOCAB,
                                   dtype=jnp.int32)
    attention_mask = jnp.ones((BATCH, SEQ), jnp.int32)
    token_type_ids = jnp.zeros((BATCH, SEQ), jnp.int32)

    out = bertweet_rcnn_forward(params, input_ids, attention_mask,
                                token_type_ids)
    out = jax.block_until_ready(out)
    assert out.shape == (BATCH, OUT_DIM)
    print("KERNEL_OK")
</pallas_src>

<mosaic_0001>
module attributes {stable_mosaic.version = 11 : i64} {
  func.func @rcnn_kernel(%arg0: memref<16x1xi32, #tpu.memory_space<vmem>>, %arg1: memref<32x64xf32, #tpu.memory_space<vmem>>, %arg2: memref<64x256xf32, #tpu.memory_space<vmem>>, %arg3: memref<1x256xf32, #tpu.memory_space<vmem>>, %arg4: memref<32x128xf32, #tpu.memory_space<vmem>>, %arg5: memref<32x128xf32, #tpu.memory_space<vmem>>, %arg6: memref<128x64xf32, #tpu.memory_space<vmem>>, %arg7: memref<1x64xf32, #tpu.memory_space<vmem>>, %arg8: memref<64x3xf32, #tpu.memory_space<vmem>>, %arg9: memref<1x3xf32, #tpu.memory_space<vmem>>, %arg10: memref<2x3xf32, #tpu.memory_space<vmem>>) attributes {dimension_semantics = [], scalar_prefetch = 0 : i64, scratch_operands = 0 : i64, tpu.core_type = #tpu.core_type<tc>} {
    %c0 = arith.constant 0 : index
    %c0_0 = arith.constant 0 : index
    %0 = vector.load %arg0[%c0, %c0_0] : memref<16x1xi32, #tpu.memory_space<vmem>>, vector<16x1xi32>
    %1 = tpu.iota {dimensions = array<i32: 1>} : vector<16x32xi32>
    %2 = vector.broadcast %0 : vector<16x1xi32> to vector<16x32xi32>
    %3 = arith.cmpi eq, %2, %1 : vector<16x32xi32>
    %4 = arith.extui %3 : vector<16x32xi1> to vector<16x32xi32>
    %5 = arith.sitofp %4 : vector<16x32xi32> to vector<16x32xf32>
    %c0_1 = arith.constant 0 : index
    %c0_2 = arith.constant 0 : index
    %6 = vector.load %arg1[%c0_1, %c0_2] : memref<32x64xf32, #tpu.memory_space<vmem>>, vector<32x64xf32>
    %cst = arith.constant dense<0.000000e+00> : vector<16x64xf32>
    %7 = tpu.matmul %5, %6, %cst {dimension_numbers = #tpu.dot_dimension_numbers<[1], [0], [0], [1], [0, 0, 1, 1], [], []>} : vector<16x32xf32>, vector<32x64xf32>, vector<16x64xf32> -> vector<16x64xf32>
    %c0_3 = arith.constant 0 : index
    %c0_4 = arith.constant 0 : index
    %8 = vector.load %arg2[%c0_3, %c0_4] : memref<64x256xf32, #tpu.memory_space<vmem>>, vector<64x256xf32>
    %cst_5 = arith.constant dense<0.000000e+00> : vector<16x256xf32>
    %9 = tpu.matmul %7, %8, %cst_5 {dimension_numbers = #tpu.dot_dimension_numbers<[1], [0], [0], [1], [0, 0, 1, 1], [], []>} : vector<16x64xf32>, vector<64x256xf32>, vector<16x256xf32> -> vector<16x256xf32>
    %c0_6 = arith.constant 0 : index
    %c0_7 = arith.constant 0 : index
    %10 = vector.load %arg3[%c0_6, %c0_7] : memref<1x256xf32, #tpu.memory_space<vmem>>, vector<1x256xf32>
    %11 = vector.broadcast %10 : vector<1x256xf32> to vector<16x256xf32>
    %12 = arith.addf %9, %11 : vector<16x256xf32>
    %c0_8 = arith.constant 0 : index
    %c0_9 = arith.constant 0 : index
    %13 = vector.load %arg4[%c0_8, %c0_9] : memref<32x128xf32, #tpu.memory_space<vmem>>, vector<32x128xf32>
    %c0_10 = arith.constant 0 : index
    %c0_11 = arith.constant 0 : index
    %14 = vector.load %arg5[%c0_10, %c0_11] : memref<32x128xf32, #tpu.memory_space<vmem>>, vector<32x128xf32>
    %cst_12 = arith.constant 0.000000e+00 : f32
    %15 = vector.broadcast %cst_12 : f32 to vector<2x32xf32>
    %cst_13 = arith.constant 0.000000e+00 : f32
    %16 = vector.broadcast %cst_13 : f32 to vector<2x32xf32>
    %cst_14 = arith.constant 0.000000e+00 : f32
    %17 = vector.broadcast %cst_14 : f32 to vector<2x32xf32>
    %cst_15 = arith.constant 0.000000e+00 : f32
    %18 = vector.broadcast %cst_15 : f32 to vector<2x32xf32>
    %19 = vector.extract_strided_slice %12 {offsets = [0, 0], sizes = [2, 128], strides = [1, 1]} : vector<16x256xf32> to vector<2x128xf32>
    %cst_16 = arith.constant dense<0.000000e+00> : vector<2x128xf32>
    %20 = tpu.matmul %15, %13, %cst_16 {dimension_numbers = #tpu.dot_dimension_numbers<[1], [0], [0], [1], [0, 0, 1, 1], [], []>} : vector<2x32xf32>, vector<32x128xf32>, vector<2x128xf32> -> vector<2x128xf32>
    %21 = arith.addf %19, %20 : vector<2x128xf32>
    %22 = vector.extract_strided_slice %21 {offsets = [0, 0], sizes = [2, 96], strides = [1, 1]} : vector<2x128xf32> to vector<2x96xf32>
    %23 = arith.negf %22 : vector<2x96xf32>
    %24 = math.exp %23 : vector<2x96xf32>
    %cst_17 = arith.constant 1.000000e+00 : f32
    %25 = vector.broadcast %cst_17 : f32 to vector<2x96xf32>
    %26 = arith.addf %25, %24 : vector<2x96xf32>
    %27 = arith.divf %25, %26 : vector<2x96xf32>
    %28 = vector.extract_strided_slice %21 {offsets = [0, 96], sizes = [2, 32], strides = [1, 1]} : vector<2x128xf32> to vector<2x32xf32>
    %29 = math.tanh %28 : vector<2x32xf32>
    %30 = vector.extract_strided_slice %27 {offsets = [0, 32], sizes = [2, 32], strides = [1, 1]} : vector<2x96xf32> to vector<2x32xf32>
    %31 = arith.mulf %30, %16 : vector<2x32xf32>
    %32 = vector.extract_strided_slice %27 {offsets = [0, 0], sizes = [2, 32], strides = [1, 1]} : vector<2x96xf32> to vector<2x32xf32>
    %33 = arith.mulf %32, %29 : vector<2x32xf32>
    %34 = arith.addf %31, %33 : vector<2x32xf32>
    %35 = vector.extract_strided_slice %27 {offsets = [0, 64], sizes = [2, 32], strides = [1, 1]} : vector<2x96xf32> to vector<2x32xf32>
    %36 = math.tanh %34 : vector<2x32xf32>
    %37 = arith.mulf %35, %36 : vector<2x32xf32>
    %38 = vector.extract_strided_slice %12 {offsets = [14, 128], sizes = [2, 128], strides = [1, 1]} : vector<16x256xf32> to vector<2x128xf32>
    %cst_18 = arith.constant dense<0.000000e+00> : vector<2x128xf32>
    %39 = tpu.matmul %17, %14, %cst_18 {dimension_numbers = #tpu.dot_dimension_numbers<[1], [0], [0], [1], [0, 0, 1, 1], [], []>} : vector<2x32xf32>, vector<32x128xf32>, vector<2x128xf32> -> vector<2x128xf32>
    %40 = arith.addf %38, %39 : vector<2x128xf32>
    %41 = vector.extract_strided_slice %40 {offsets = [0, 0], sizes = [2, 96], strides = [1, 1]} : vector<2x128xf32> to vector<2x96xf32>
    %42 = arith.negf %41 : vector<2x96xf32>
    %43 = math.exp %42 : vector<2x96xf32>
    %cst_19 = arith.constant 1.000000e+00 : f32
    %44 = vector.broadcast %cst_19 : f32 to vector<2x96xf32>
    %45 = arith.addf %44, %43 : vector<2x96xf32>
    %46 = arith.divf %44, %45 : vector<2x96xf32>
    %47 = vector.extract_strided_slice %40 {offsets = [0, 96], sizes = [2, 32], strides = [1, 1]} : vector<2x128xf32> to vector<2x32xf32>
    %48 = math.tanh %47 : vector<2x32xf32>
    %49 = vector.extract_strided_slice %46 {offsets = [0, 32], sizes = [2, 32], strides = [1, 1]} : vector<2x96xf32> to vector<2x32xf32>
    %50 = arith.mulf %49, %18 : vector<2x32xf32>
    %51 = vector.extract_strided_slice %46 {offsets = [0, 0], sizes = [2, 32], strides = [1, 1]} : vector<2x96xf32> to vector<2x32xf32>
    %52 = arith.mulf %51, %48 : vector<2x32xf32>
    %53 = arith.addf %50, %52 : vector<2x32xf32>
    %54 = vector.extract_strided_slice %46 {offsets = [0, 64], sizes = [2, 32], strides = [1, 1]} : vector<2x96xf32> to vector<2x32xf32>
    %55 = math.tanh %53 : vector<2x32xf32>
    %56 = arith.mulf %54, %55 : vector<2x32xf32>
    %57 = vector.extract_strided_slice %12 {offsets = [2, 0], sizes = [2, 128], strides = [1, 1]} : vector<16x256xf32> to vector<2x128xf32>
    %cst_20 = arith.constant dense<0.000000e+00> : vector<2x128xf32>
    %58 = tpu.matmul %37, %13, %cst_20 {dimension_numbers = #tpu.dot_dimension_numbers<[1], [0], [0], [1], [0, 0, 1, 1], [], []>} : vector<2x32xf32>, vector<32x128xf32>, vector<2x128xf32> -> vector<2x128xf32>
    %59 = arith.addf %57, %58 : vector<2x128xf32>
    %60 = vector.extract_strided_slice %59 {offsets = [0, 0], sizes = [2, 96], strides = [1, 1]} : vector<2x128xf32> to vector<2x96xf32>
    %61 = arith.negf %60 : vector<2x96xf32>
    %62 = math.exp %61 : vector<2x96xf32>
    %cst_21 = arith.constant 1.000000e+00 : f32
    %63 = vector.broadcast %cst_21 : f32 to vector<2x96xf32>
    %64 = arith.addf %63, %62 : vector<2x96xf32>
    %65 = arith.divf %63, %64 : vector<2x96xf32>
    %66 = vector.extract_strided_slice %59 {offsets = [0, 96], sizes = [2, 32], strides = [1, 1]} : vector<2x128xf32> to vector<2x32xf32>
    %67 = math.tanh %66 : vector<2x32xf32>
    %68 = vector.extract_strided_slice %65 {offsets = [0, 32], sizes = [2, 32], strides = [1, 1]} : vector<2x96xf32> to vector<2x32xf32>
    %69 = arith.mulf %68, %34 : vector<2x32xf32>
    %70 = vector.extract_strided_slice %65 {offsets = [0, 0], sizes = [2, 32], strides = [1, 1]} : vector<2x96xf32> to vector<2x32xf32>
    %71 = arith.mulf %70, %67 : vector<2x32xf32>
    %72 = arith.addf %69, %71 : vector<2x32xf32>
    %73 = vector.extract_strided_slice %65 {offsets = [0, 64], sizes = [2, 32], strides = [1, 1]} : vector<2x96xf32> to vector<2x32xf32>
    %74 = math.tanh %72 : vector<2x32xf32>
    %75 = arith.mulf %73, %74 : vector<2x32xf32>
    %76 = vector.extract_strided_slice %12 {offsets = [12, 128], sizes = [2, 128], strides = [1, 1]} : vector<16x256xf32> to vector<2x128xf32>
    %cst_22 = arith.constant dense<0.000000e+00> : vector<2x128xf32>
    %77 = tpu.matmul %56, %14, %cst_22 {dimension_numbers = #tpu.dot_dimension_numbers<[1], [0], [0], [1], [0, 0, 1, 1], [], []>} : vector<2x32xf32>, vector<32x128xf32>, vector<2x128xf32> -> vector<2x128xf32>
    %78 = arith.addf %76, %77 : vector<2x128xf32>
    %79 = vector.extract_strided_slice %78 {offsets = [0, 0], sizes = [2, 96], strides = [1, 1]} : vector<2x128xf32> to vector<2x96xf32>
    %80 = arith.negf %79 : vector<2x96xf32>
    %81 = math.exp %80 : vector<2x96xf32>
    %cst_23 = arith.constant 1.000000e+00 : f32
    %82 = vector.broadcast %cst_23 : f32 to vector<2x96xf32>
    %83 = arith.addf %82, %81 : vector<2x96xf32>
    %84 = arith.divf %82, %83 : vector<2x96xf32>
    %85 = vector.extract_strided_slice %78 {offsets = [0, 96], sizes = [2, 32], strides = [1, 1]} : vector<2x128xf32> to vector<2x32xf32>
    %86 = math.tanh %85 : vector<2x32xf32>
    %87 = vector.extract_strided_slice %84 {offsets = [0, 32], sizes = [2, 32], strides = [1, 1]} : vector<2x96xf32> to vector<2x32xf32>
    %88 = arith.mulf %87, %53 : vector<2x32xf32>
    %89 = vector.extract_strided_slice %84 {offsets = [0, 0], sizes = [2, 32], strides = [1, 1]} : vector<2x96xf32> to vector<2x32xf32>
    %90 = arith.mulf %89, %86 : vector<2x32xf32>
    %91 = arith.addf %88, %90 : vector<2x32xf32>
    %92 = vector.extract_strided_slice %84 {offsets = [0, 64], sizes = [2, 32], strides = [1, 1]} : vector<2x96xf32> to vector<2x32xf32>
    %93 = math.tanh %91 : vector<2x32xf32>
    %94 = arith.mulf %92, %93 : vector<2x32xf32>
    %95 = vector.extract_strided_slice %12 {offsets = [4, 0], sizes = [2, 128], strides = [1, 1]} : vector<16x256xf32> to vector<2x128xf32>
    %cst_24 = arith.constant dense<0.000000e+00> : vector<2x128xf32>
    %96 = tpu.matmul %75, %13, %cst_24 {dimension_numbers = #tpu.dot_dimension_numbers<[1], [0], [0], [1], [0, 0, 1, 1], [], []>} : vector<2x32xf32>, vector<32x128xf32>, vector<2x128xf32> -> vector<2x128xf32>
    %97 = arith.addf %95, %96 : vector<2x128xf32>
    %98 = vector.extract_strided_slice %97 {offsets = [0, 0], sizes = [2, 96], strides = [1, 1]} : vector<2x128xf32> to vector<2x96xf32>
    %99 = arith.negf %98 : vector<2x96xf32>
    %100 = math.exp %99 : vector<2x96xf32>
    %cst_25 = arith.constant 1.000000e+00 : f32
    %101 = vector.broadcast %cst_25 : f32 to vector<2x96xf32>
    %102 = arith.addf %101, %100 : vector<2x96xf32>
    %103 = arith.divf %101, %102 : vector<2x96xf32>
    %104 = vector.extract_strided_slice %97 {offsets = [0, 96], sizes = [2, 32], strides = [1, 1]} : vector<2x128xf32> to vector<2x32xf32>
    %105 = math.tanh %104 : vector<2x32xf32>
    %106 = vector.extract_strided_slice %103 {offsets = [0, 32], sizes = [2, 32], strides = [1, 1]} : vector<2x96xf32> to vector<2x32xf32>
    %107 = arith.mulf %106, %72 : vector<2x32xf32>
    %108 = vector.extract_strided_slice %103 {offsets = [0, 0], sizes = [2, 32], strides = [1, 1]} : vector<2x96xf32> to vector<2x32xf32>
    %109 = arith.mulf %108, %105 : vector<2x32xf32>
    %110 = arith.addf %107, %109 : vector<2x32xf32>
    %111 = vector.extract_strided_slice %103 {offsets = [0, 64], sizes = [2, 32], strides = [1, 1]} : vector<2x96xf32> to vector<2x32xf32>
    %112 = math.tanh %110 : vector<2x32xf32>
    %113 = arith.mulf %111, %112 : vector<2x32xf32>
    %114 = vector.extract_strided_slice %12 {offsets = [10, 128], sizes = [2, 128], strides = [1, 1]} : vector<16x256xf32> to vector<2x128xf32>
    %cst_26 = arith.constant dense<0.000000e+00> : vector<2x128xf32>
    %115 = tpu.matmul %94, %14, %cst_26 {dimension_numbers = #tpu.dot_dimension_numbers<[1], [0], [0], [1], [0, 0, 1, 1], [], []>} : vector<2x32xf32>, vector<32x128xf32>, vector<2x128xf32> -> vector<2x128xf32>
    %116 = arith.addf %114, %115 : vector<2x128xf32>
    %117 = vector.extract_strided_slice %116 {offsets = [0, 0], sizes = [2, 96], strides = [1, 1]} : vector<2x128xf32> to vector<2x96xf32>
    %118 = arith.negf %117 : vector<2x96xf32>
    %119 = math.exp %118 : vector<2x96xf32>
    %cst_27 = arith.constant 1.000000e+00 : f32
    %120 = vector.broadcast %cst_27 : f32 to vector<2x96xf32>
    %121 = arith.addf %120, %119 : vector<2x96xf32>
    %122 = arith.divf %120, %121 : vector<2x96xf32>
    %123 = vector.extract_strided_slice %116 {offsets = [0, 96], sizes = [2, 32], strides = [1, 1]} : vector<2x128xf32> to vector<2x32xf32>
    %124 = math.tanh %123 : vector<2x32xf32>
    %125 = vector.extract_strided_slice %122 {offsets = [0, 32], sizes = [2, 32], strides = [1, 1]} : vector<2x96xf32> to vector<2x32xf32>
    %126 = arith.mulf %125, %91 : vector<2x32xf32>
    %127 = vector.extract_strided_slice %122 {offsets = [0, 0], sizes = [2, 32], strides = [1, 1]} : vector<2x96xf32> to vector<2x32xf32>
    %128 = arith.mulf %127, %124 : vector<2x32xf32>
    %129 = arith.addf %126, %128 : vector<2x32xf32>
    %130 = vector.extract_strided_slice %122 {offsets = [0, 64], sizes = [2, 32], strides = [1, 1]} : vector<2x96xf32> to vector<2x32xf32>
    %131 = math.tanh %129 : vector<2x32xf32>
    %132 = arith.mulf %130, %131 : vector<2x32xf32>
    %133 = vector.extract_strided_slice %12 {offsets = [6, 0], sizes = [2, 128], strides = [1, 1]} : vector<16x256xf32> to vector<2x128xf32>
    %cst_28 = arith.constant dense<0.000000e+00> : vector<2x128xf32>
    %134 = tpu.matmul %113, %13, %cst_28 {dimension_numbers = #tpu.dot_dimension_numbers<[1], [0], [0], [1], [0, 0, 1, 1], [], []>} : vector<2x32xf32>, vector<32x128xf32>, vector<2x128xf32> -> vector<2x128xf32>
    %135 = arith.addf %133, %134 : vector<2x128xf32>
    %136 = vector.extract_strided_slice %135 {offsets = [0, 0], sizes = [2, 96], strides = [1, 1]} : vector<2x128xf32> to vector<2x96xf32>
    %137 = arith.negf %136 : vector<2x96xf32>
    %138 = math.exp %137 : vector<2x96xf32>
    %cst_29 = arith.constant 1.000000e+00 : f32
    %139 = vector.broadcast %cst_29 : f32 to vector<2x96xf32>
    %140 = arith.addf %139, %138 : vector<2x96xf32>
    %141 = arith.divf %139, %140 : vector<2x96xf32>
    %142 = vector.extract_strided_slice %135 {offsets = [0, 96], sizes = [2, 32], strides = [1, 1]} : vector<2x128xf32> to vector<2x32xf32>
    %143 = math.tanh %142 : vector<2x32xf32>
    %144 = vector.extract_strided_slice %141 {offsets = [0, 32], sizes = [2, 32], strides = [1, 1]} : vector<2x96xf32> to vector<2x32xf32>
    %145 = arith.mulf %144, %110 : vector<2x32xf32>
    %146 = vector.extract_strided_slice %141 {offsets = [0, 0], sizes = [2, 32], strides = [1, 1]} : vector<2x96xf32> to vector<2x32xf32>
    %147 = arith.mulf %146, %143 : vector<2x32xf32>
    %148 = arith.addf %145, %147 : vector<2x32xf32>
    %149 = vector.extract_strided_slice %141 {offsets = [0, 64], sizes = [2, 32], strides = [1, 1]} : vector<2x96xf32> to vector<2x32xf32>
    %150 = math.tanh %148 : vector<2x32xf32>
    %151 = arith.mulf %149, %150 : vector<2x32xf32>
    %152 = vector.extract_strided_slice %12 {offsets = [8, 128], sizes = [2, 128], strides = [1, 1]} : vector<16x256xf32> to vector<2x128xf32>
    %cst_30 = arith.constant dense<0.000000e+00> : vector<2x128xf32>
    %153 = tpu.matmul %132, %14, %cst_30 {dimension_numbers = #tpu.dot_dimension_numbers<[1], [0], [0], [1], [0, 0, 1, 1], [], []>} : vector<2x32xf32>, vector<32x128xf32>, vector<2x128xf32> -> vector<2x128xf32>
    %154 = arith.addf %152, %153 : vector<2x128xf32>
    %155 = vector.extract_strided_slice %154 {offsets = [0, 0], sizes = [2, 96], strides = [1, 1]} : vector<2x128xf32> to vector<2x96xf32>
    %156 = arith.negf %155 : vector<2x96xf32>
    %157 = math.exp %156 : vector<2x96xf32>
    %cst_31 = arith.constant 1.000000e+00 : f32
    %158 = vector.broadcast %cst_31 : f32 to vector<2x96xf32>
    %159 = arith.addf %158, %157 : vector<2x96xf32>
    %160 = arith.divf %158, %159 : vector<2x96xf32>
    %161 = vector.extract_strided_slice %154 {offsets = [0, 96], sizes = [2, 32], strides = [1, 1]} : vector<2x128xf32> to vector<2x32xf32>
    %162 = math.tanh %161 : vector<2x32xf32>
    %163 = vector.extract_strided_slice %160 {offsets = [0, 32], sizes = [2, 32], strides = [1, 1]} : vector<2x96xf32> to vector<2x32xf32>
    %164 = arith.mulf %163, %129 : vector<2x32xf32>
    %165 = vector.extract_strided_slice %160 {offsets = [0, 0], sizes = [2, 32], strides = [1, 1]} : vector<2x96xf32> to vector<2x32xf32>
    %166 = arith.mulf %165, %162 : vector<2x32xf32>
    %167 = arith.addf %164, %166 : vector<2x32xf32>
    %168 = vector.extract_strided_slice %160 {offsets = [0, 64], sizes = [2, 32], strides = [1, 1]} : vector<2x96xf32> to vector<2x32xf32>
    %169 = math.tanh %167 : vector<2x32xf32>
    %170 = arith.mulf %168, %169 : vector<2x32xf32>
    %171 = vector.extract_strided_slice %12 {offsets = [8, 0], sizes = [2, 128], strides = [1, 1]} : vector<16x256xf32> to vector<2x128xf32>
    %cst_32 = arith.constant dense<0.000000e+00> : vector<2x128xf32>
    %172 = tpu.matmul %151, %13, %cst_32 {dimension_numbers = #tpu.dot_dimension_numbers<[1], [0], [0], [1], [0, 0, 1, 1], [], []>} : vector<2x32xf32>, vector<32x128xf32>, vector<2x128xf32> -> vector<2x128xf32>
    %173 = arith.addf %171, %172 : vector<2x128xf32>
    %174 = vector.extract_strided_slice %173 {offsets = [0, 0], sizes = [2, 96], strides = [1, 1]} : vector<2x128xf32> to vector<2x96xf32>
    %175 = arith.negf %174 : vector<2x96xf32>
    %176 = math.exp %175 : vector<2x96xf32>
    %cst_33 = arith.constant 1.000000e+00 : f32
    %177 = vector.broadcast %cst_33 : f32 to vector<2x96xf32>
    %178 = arith.addf %177, %176 : vector<2x96xf32>
    %179 = arith.divf %177, %178 : vector<2x96xf32>
    %180 = vector.extract_strided_slice %173 {offsets = [0, 96], sizes = [2, 32], strides = [1, 1]} : vector<2x128xf32> to vector<2x32xf32>
    %181 = math.tanh %180 : vector<2x32xf32>
    %182 = vector.extract_strided_slice %179 {offsets = [0, 32], sizes = [2, 32], strides = [1, 1]} : vector<2x96xf32> to vector<2x32xf32>
    %183 = arith.mulf %182, %148 : vector<2x32xf32>
    %184 = vector.extract_strided_slice %179 {offsets = [0, 0], sizes = [2, 32], strides = [1, 1]} : vector<2x96xf32> to vector<2x32xf32>
    %185 = arith.mulf %184, %181 : vector<2x32xf32>
    %186 = arith.addf %183, %185 : vector<2x32xf32>
    %187 = vector.extract_strided_slice %179 {offsets = [0, 64], sizes = [2, 32], strides = [1, 1]} : vector<2x96xf32> to vector<2x32xf32>
    %188 = math.tanh %186 : vector<2x32xf32>
    %189 = arith.mulf %187, %188 : vector<2x32xf32>
    %190 = vector.extract_strided_slice %12 {offsets = [6, 128], sizes = [2, 128], strides = [1, 1]} : vector<16x256xf32> to vector<2x128xf32>
    %cst_34 = arith.constant dense<0.000000e+00> : vector<2x128xf32>
    %191 = tpu.matmul %170, %14, %cst_34 {dimension_numbers = #tpu.dot_dimension_numbers<[1], [0], [0], [1], [0, 0, 1, 1], [], []>} : vector<2x32xf32>, vector<32x128xf32>, vector<2x128xf32> -> vector<2x128xf32>
    %192 = arith.addf %190, %191 : vector<2x128xf32>
    %193 = vector.extract_strided_slice %192 {offsets = [0, 0], sizes = [2, 96], strides = [1, 1]} : vector<2x128xf32> to vector<2x96xf32>
    %194 = arith.negf %193 : vector<2x96xf32>
    %195 = math.exp %194 : vector<2x96xf32>
    %cst_35 = arith.constant 1.000000e+00 : f32
    %196 = vector.broadcast %cst_35 : f32 to vector<2x96xf32>
    %197 = arith.addf %196, %195 : vector<2x96xf32>
    %198 = arith.divf %196, %197 : vector<2x96xf32>
    %199 = vector.extract_strided_slice %192 {offsets = [0, 96], sizes = [2, 32], strides = [1, 1]} : vector<2x128xf32> to vector<2x32xf32>
    %200 = math.tanh %199 : vector<2x32xf32>
    %201 = vector.extract_strided_slice %198 {offsets = [0, 32], sizes = [2, 32], strides = [1, 1]} : vector<2x96xf32> to vector<2x32xf32>
    %202 = arith.mulf %201, %167 : vector<2x32xf32>
    %203 = vector.extract_strided_slice %198 {offsets = [0, 0], sizes = [2, 32], strides = [1, 1]} : vector<2x96xf32> to vector<2x32xf32>
    %204 = arith.mulf %203, %200 : vector<2x32xf32>
    %205 = arith.addf %202, %204 : vector<2x32xf32>
    %206 = vector.extract_strided_slice %198 {offsets = [0, 64], sizes = [2, 32], strides = [1, 1]} : vector<2x96xf32> to vector<2x32xf32>
    %207 = math.tanh %205 : vector<2x32xf32>
    %208 = arith.mulf %206, %207 : vector<2x32xf32>
    %209 = vector.extract_strided_slice %12 {offsets = [10, 0], sizes = [2, 128], strides = [1, 1]} : vector<16x256xf32> to vector<2x128xf32>
    %cst_36 = arith.constant dense<0.000000e+00> : vector<2x128xf32>
    %210 = tpu.matmul %189, %13, %cst_36 {dimension_numbers = #tpu.dot_dimension_numbers<[1], [0], [0], [1], [0, 0, 1, 1], [], []>} : vector<2x32xf32>, vector<32x128xf32>, vector<2x128xf32> -> vector<2x128xf32>
    %211 = arith.addf %209, %210 : vector<2x128xf32>
    %212 = vector.extract_strided_slice %211 {offsets = [0, 0], sizes = [2, 96], strides = [1, 1]} : vector<2x128xf32> to vector<2x96xf32>
    %213 = arith.negf %212 : vector<2x96xf32>
    %214 = math.exp %213 : vector<2x96xf32>
    %cst_37 = arith.constant 1.000000e+00 : f32
    %215 = vector.broadcast %cst_37 : f32 to vector<2x96xf32>
    %216 = arith.addf %215, %214 : vector<2x96xf32>
    %217 = arith.divf %215, %216 : vector<2x96xf32>
    %218 = vector.extract_strided_slice %211 {offsets = [0, 96], sizes = [2, 32], strides = [1, 1]} : vector<2x128xf32> to vector<2x32xf32>
    %219 = math.tanh %218 : vector<2x32xf32>
    %220 = vector.extract_strided_slice %217 {offsets = [0, 32], sizes = [2, 32], strides = [1, 1]} : vector<2x96xf32> to vector<2x32xf32>
    %221 = arith.mulf %220, %186 : vector<2x32xf32>
    %222 = vector.extract_strided_slice %217 {offsets = [0, 0], sizes = [2, 32], strides = [1, 1]} : vector<2x96xf32> to vector<2x32xf32>
    %223 = arith.mulf %222, %219 : vector<2x32xf32>
    %224 = arith.addf %221, %223 : vector<2x32xf32>
    %225 = vector.extract_strided_slice %217 {offsets = [0, 64], sizes = [2, 32], strides = [1, 1]} : vector<2x96xf32> to vector<2x32xf32>
    %226 = math.tanh %224 : vector<2x32xf32>
    %227 = arith.mulf %225, %226 : vector<2x32xf32>
    %228 = vector.extract_strided_slice %12 {offsets = [4, 128], sizes = [2, 128], strides = [1, 1]} : vector<16x256xf32> to vector<2x128xf32>
    %cst_38 = arith.constant dense<0.000000e+00> : vector<2x128xf32>
    %229 = tpu.matmul %208, %14, %cst_38 {dimension_numbers = #tpu.dot_dimension_numbers<[1], [0], [0], [1], [0, 0, 1, 1], [], []>} : vector<2x32xf32>, vector<32x128xf32>, vector<2x128xf32> -> vector<2x128xf32>
    %230 = arith.addf %228, %229 : vector<2x128xf32>
    %231 = vector.extract_strided_slice %230 {offsets = [0, 0], sizes = [2, 96], strides = [1, 1]} : vector<2x128xf32> to vector<2x96xf32>
    %232 = arith.negf %231 : vector<2x96xf32>
    %233 = math.exp %232 : vector<2x96xf32>
    %cst_39 = arith.constant 1.000000e+00 : f32
    %234 = vector.broadcast %cst_39 : f32 to vector<2x96xf32>
    %235 = arith.addf %234, %233 : vector<2x96xf32>
    %236 = arith.divf %234, %235 : vector<2x96xf32>
    %237 = vector.extract_strided_slice %230 {offsets = [0, 96], sizes = [2, 32], strides = [1, 1]} : vector<2x128xf32> to vector<2x32xf32>
    %238 = math.tanh %237 : vector<2x32xf32>
    %239 = vector.extract_strided_slice %236 {offsets = [0, 32], sizes = [2, 32], strides = [1, 1]} : vector<2x96xf32> to vector<2x32xf32>
    %240 = arith.mulf %239, %205 : vector<2x32xf32>
    %241 = vector.extract_strided_slice %236 {offsets = [0, 0], sizes = [2, 32], strides = [1, 1]} : vector<2x96xf32> to vector<2x32xf32>
    %242 = arith.mulf %241, %238 : vector<2x32xf32>
    %243 = arith.addf %240, %242 : vector<2x32xf32>
    %244 = vector.extract_strided_slice %236 {offsets = [0, 64], sizes = [2, 32], strides = [1, 1]} : vector<2x96xf32> to vector<2x32xf32>
    %245 = math.tanh %243 : vector<2x32xf32>
    %246 = arith.mulf %244, %245 : vector<2x32xf32>
    %247 = vector.extract_strided_slice %12 {offsets = [12, 0], sizes = [2, 128], strides = [1, 1]} : vector<16x256xf32> to vector<2x128xf32>
    %cst_40 = arith.constant dense<0.000000e+00> : vector<2x128xf32>
    %248 = tpu.matmul %227, %13, %cst_40 {dimension_numbers = #tpu.dot_dimension_numbers<[1], [0], [0], [1], [0, 0, 1, 1], [], []>} : vector<2x32xf32>, vector<32x128xf32>, vector<2x128xf32> -> vector<2x128xf32>
    %249 = arith.addf %247, %248 : vector<2x128xf32>
    %250 = vector.extract_strided_slice %249 {offsets = [0, 0], sizes = [2, 96], strides = [1, 1]} : vector<2x128xf32> to vector<2x96xf32>
    %251 = arith.negf %250 : vector<2x96xf32>
    %252 = math.exp %251 : vector<2x96xf32>
    %cst_41 = arith.constant 1.000000e+00 : f32
    %253 = vector.broadcast %cst_41 : f32 to vector<2x96xf32>
    %254 = arith.addf %253, %252 : vector<2x96xf32>
    %255 = arith.divf %253, %254 : vector<2x96xf32>
    %256 = vector.extract_strided_slice %249 {offsets = [0, 96], sizes = [2, 32], strides = [1, 1]} : vector<2x128xf32> to vector<2x32xf32>
    %257 = math.tanh %256 : vector<2x32xf32>
    %258 = vector.extract_strided_slice %255 {offsets = [0, 32], sizes = [2, 32], strides = [1, 1]} : vector<2x96xf32> to vector<2x32xf32>
    %259 = arith.mulf %258, %224 : vector<2x32xf32>
    %260 = vector.extract_strided_slice %255 {offsets = [0, 0], sizes = [2, 32], strides = [1, 1]} : vector<2x96xf32> to vector<2x32xf32>
    %261 = arith.mulf %260, %257 : vector<2x32xf32>
    %262 = arith.addf %259, %261 : vector<2x32xf32>
    %263 = vector.extract_strided_slice %255 {offsets = [0, 64], sizes = [2, 32], strides = [1, 1]} : vector<2x96xf32> to vector<2x32xf32>
    %264 = math.tanh %262 : vector<2x32xf32>
    %265 = arith.mulf %263, %264 : vector<2x32xf32>
    %266 = vector.extract_strided_slice %12 {offsets = [2, 128], sizes = [2, 128], strides = [1, 1]} : vector<16x256xf32> to vector<2x128xf32>
    %cst_42 = arith.constant dense<0.000000e+00> : vector<2x128xf32>
    %267 = tpu.matmul %246, %14, %cst_42 {dimension_numbers = #tpu.dot_dimension_numbers<[1], [0], [0], [1], [0, 0, 1, 1], [], []>} : vector<2x32xf32>, vector<32x128xf32>, vector<2x128xf32> -> vector<2x128xf32>
    %268 = arith.addf %266, %267 : vector<2x128xf32>
    %269 = vector.extract_strided_slice %268 {offsets = [0, 0], sizes = [2, 96], strides = [1, 1]} : vector<2x128xf32> to vector<2x96xf32>
    %270 = arith.negf %269 : vector<2x96xf32>
    %271 = math.exp %270 : vector<2x96xf32>
    %cst_43 = arith.constant 1.000000e+00 : f32
    %272 = vector.broadcast %cst_43 : f32 to vector<2x96xf32>
    %273 = arith.addf %272, %271 : vector<2x96xf32>
    %274 = arith.divf %272, %273 : vector<2x96xf32>
    %275 = vector.extract_strided_slice %268 {offsets = [0, 96], sizes = [2, 32], strides = [1, 1]} : vector<2x128xf32> to vector<2x32xf32>
    %276 = math.tanh %275 : vector<2x32xf32>
    %277 = vector.extract_strided_slice %274 {offsets = [0, 32], sizes = [2, 32], strides = [1, 1]} : vector<2x96xf32> to vector<2x32xf32>
    %278 = arith.mulf %277, %243 : vector<2x32xf32>
    %279 = vector.extract_strided_slice %274 {offsets = [0, 0], sizes = [2, 32], strides = [1, 1]} : vector<2x96xf32> to vector<2x32xf32>
    %280 = arith.mulf %279, %276 : vector<2x32xf32>
    %281 = arith.addf %278, %280 : vector<2x32xf32>
    %282 = vector.extract_strided_slice %274 {offsets = [0, 64], sizes = [2, 32], strides = [1, 1]} : vector<2x96xf32> to vector<2x32xf32>
    %283 = math.tanh %281 : vector<2x32xf32>
    %284 = arith.mulf %282, %283 : vector<2x32xf32>
    %285 = vector.extract_strided_slice %12 {offsets = [14, 0], sizes = [2, 128], strides = [1, 1]} : vector<16x256xf32> to vector<2x128xf32>
    %cst_44 = arith.constant dense<0.000000e+00> : vector<2x128xf32>
    %286 = tpu.matmul %265, %13, %cst_44 {dimension_numbers = #tpu.dot_dimension_numbers<[1], [0], [0], [1], [0, 0, 1, 1], [], []>} : vector<2x32xf32>, vector<32x128xf32>, vector<2x128xf32> -> vector<2x128xf32>
    %287 = arith.addf %285, %286 : vector<2x128xf32>
    %288 = vector.extract_strided_slice %287 {offsets = [0, 0], sizes = [2, 96], strides = [1, 1]} : vector<2x128xf32> to vector<2x96xf32>
    %289 = arith.negf %288 : vector<2x96xf32>
    %290 = math.exp %289 : vector<2x96xf32>
    %cst_45 = arith.constant 1.000000e+00 : f32
    %291 = vector.broadcast %cst_45 : f32 to vector<2x96xf32>
    %292 = arith.addf %291, %290 : vector<2x96xf32>
    %293 = arith.divf %291, %292 : vector<2x96xf32>
    %294 = vector.extract_strided_slice %287 {offsets = [0, 96], sizes = [2, 32], strides = [1, 1]} : vector<2x128xf32> to vector<2x32xf32>
    %295 = math.tanh %294 : vector<2x32xf32>
    %296 = vector.extract_strided_slice %293 {offsets = [0, 32], sizes = [2, 32], strides = [1, 1]} : vector<2x96xf32> to vector<2x32xf32>
    %297 = arith.mulf %296, %262 : vector<2x32xf32>
    %298 = vector.extract_strided_slice %293 {offsets = [0, 0], sizes = [2, 32], strides = [1, 1]} : vector<2x96xf32> to vector<2x32xf32>
    %299 = arith.mulf %298, %295 : vector<2x32xf32>
    %300 = arith.addf %297, %299 : vector<2x32xf32>
    %301 = vector.extract_strided_slice %293 {offsets = [0, 64], sizes = [2, 32], strides = [1, 1]} : vector<2x96xf32> to vector<2x32xf32>
    %302 = math.tanh %300 : vector<2x32xf32>
    %303 = arith.mulf %301, %302 : vector<2x32xf32>
    %304 = vector.extract_strided_slice %12 {offsets = [0, 128], sizes = [2, 128], strides = [1, 1]} : vector<16x256xf32> to vector<2x128xf32>
    %cst_46 = arith.constant dense<0.000000e+00> : vector<2x128xf32>
    %305 = tpu.matmul %284, %14, %cst_46 {dimension_numbers = #tpu.dot_dimension_numbers<[1], [0], [0], [1], [0, 0, 1, 1], [], []>} : vector<2x32xf32>, vector<32x128xf32>, vector<2x128xf32> -> vector<2x128xf32>
    %306 = arith.addf %304, %305 : vector<2x128xf32>
    %307 = vector.extract_strided_slice %306 {offsets = [0, 0], sizes = [2, 96], strides = [1, 1]} : vector<2x128xf32> to vector<2x96xf32>
    %308 = arith.negf %307 : vector<2x96xf32>
    %309 = math.exp %308 : vector<2x96xf32>
    %cst_47 = arith.constant 1.000000e+00 : f32
    %310 = vector.broadcast %cst_47 : f32 to vector<2x96xf32>
    %311 = arith.addf %310, %309 : vector<2x96xf32>
    %312 = arith.divf %310, %311 : vector<2x96xf32>
    %313 = vector.extract_strided_slice %306 {offsets = [0, 96], sizes = [2, 32], strides = [1, 1]} : vector<2x128xf32> to vector<2x32xf32>
    %314 = math.tanh %313 : vector<2x32xf32>
    %315 = vector.extract_strided_slice %312 {offsets = [0, 32], sizes = [2, 32], strides = [1, 1]} : vector<2x96xf32> to vector<2x32xf32>
    %316 = arith.mulf %315, %281 : vector<2x32xf32>
    %317 = vector.extract_strided_slice %312 {offsets = [0, 0], sizes = [2, 32], strides = [1, 1]} : vector<2x96xf32> to vector<2x32xf32>
    %318 = arith.mulf %317, %314 : vector<2x32xf32>
    %319 = arith.addf %316, %318 : vector<2x32xf32>
    %320 = vector.extract_strided_slice %312 {offsets = [0, 64], sizes = [2, 32], strides = [1, 1]} : vector<2x96xf32> to vector<2x32xf32>
    %321 = math.tanh %319 : vector<2x32xf32>
    %322 = arith.mulf %320, %321 : vector<2x32xf32>
    %323 = tpu.concatenate %37, %75, %113, %151, %189, %227, %265, %303 in 0 : vector<2x32xf32>, vector<2x32xf32>, vector<2x32xf32>, vector<2x32xf32>, vector<2x32xf32>, vector<2x32xf32>, vector<2x32xf32>, vector<2x32xf32> -> vector<16x32xf32>
    %324 = tpu.concatenate %322, %284, %246, %208, %170, %132, %94, %56 in 0 : vector<2x32xf32>, vector<2x32xf32>, vector<2x32xf32>, vector<2x32xf32>, vector<2x32xf32>, vector<2x32xf32>, vector<2x32xf32>, vector<2x32xf32> -> vector<16x32xf32>
    %325 = tpu.concatenate %323, %324, %7 in 1 : vector<16x32xf32>, vector<16x32xf32>, vector<16x64xf32> -> vector<16x128xf32>
    %c0_48 = arith.constant 0 : index
    %c0_49 = arith.constant 0 : index
    %326 = vector.load %arg6[%c0_48, %c0_49] : memref<128x64xf32, #tpu.memory_space<vmem>>, vector<128x64xf32>
    %cst_50 = arith.constant dense<0.000000e+00> : vector<16x64xf32>
    %327 = tpu.matmul %325, %326, %cst_50 {dimension_numbers = #tpu.dot_dimension_numbers<[1], [0], [0], [1], [0, 0, 1, 1], [], []>} : vector<16x128xf32>, vector<128x64xf32>, vector<16x64xf32> -> vector<16x64xf32>
    %c0_51 = arith.constant 0 : index
    %c0_52 = arith.constant 0 : index
    %328 = vector.load %arg7[%c0_51, %c0_52] : memref<1x64xf32, #tpu.memory_space<vmem>>, vector<1x64xf32>
    %329 = vector.broadcast %328 : vector<1x64xf32> to vector<16x64xf32>
    %330 = arith.addf %327, %329 : vector<16x64xf32>
    %331 = math.tanh %330 : vector<16x64xf32>
    %332 = vector.extract_strided_slice %331 {offsets = [0, 0], sizes = [2, 64], strides = [1, 1]} : vector<16x64xf32> to vector<2x64xf32>
    %333 = vector.extract_strided_slice %331 {offsets = [2, 0], sizes = [2, 64], strides = [1, 1]} : vector<16x64xf32> to vector<2x64xf32>
    %334 = arith.maximumf %332, %333 : vector<2x64xf32>
    %335 = vector.extract_strided_slice %331 {offsets = [4, 0], sizes = [2, 64], strides = [1, 1]} : vector<16x64xf32> to vector<2x64xf32>
    %336 = arith.maximumf %334, %335 : vector<2x64xf32>
    %337 = vector.extract_strided_slice %331 {offsets = [6, 0], sizes = [2, 64], strides = [1, 1]} : vector<16x64xf32> to vector<2x64xf32>
    %338 = arith.maximumf %336, %337 : vector<2x64xf32>
    %339 = vector.extract_strided_slice %331 {offsets = [8, 0], sizes = [2, 64], strides = [1, 1]} : vector<16x64xf32> to vector<2x64xf32>
    %340 = arith.maximumf %338, %339 : vector<2x64xf32>
    %341 = vector.extract_strided_slice %331 {offsets = [10, 0], sizes = [2, 64], strides = [1, 1]} : vector<16x64xf32> to vector<2x64xf32>
    %342 = arith.maximumf %340, %341 : vector<2x64xf32>
    %343 = vector.extract_strided_slice %331 {offsets = [12, 0], sizes = [2, 64], strides = [1, 1]} : vector<16x64xf32> to vector<2x64xf32>
    %344 = arith.maximumf %342, %343 : vector<2x64xf32>
    %345 = vector.extract_strided_slice %331 {offsets = [14, 0], sizes = [2, 64], strides = [1, 1]} : vector<16x64xf32> to vector<2x64xf32>
    %346 = arith.maximumf %344, %345 : vector<2x64xf32>
    %c0_53 = arith.constant 0 : index
    %c0_54 = arith.constant 0 : index
    %347 = vector.load %arg8[%c0_53, %c0_54] : memref<64x3xf32, #tpu.memory_space<vmem>>, vector<64x3xf32>
    %cst_55 = arith.constant dense<0.000000e+00> : vector<2x3xf32>
    %348 = tpu.matmul %346, %347, %cst_55 {dimension_numbers = #tpu.dot_dimension_numbers<[1], [0], [0], [1], [0, 0, 1, 1], [], []>} : vector<2x64xf32>, vector<64x3xf32>, vector<2x3xf32> -> vector<2x3xf32>
    %c0_56 = arith.constant 0 : index
    %c0_57 = arith.constant 0 : index
    %349 = vector.load %arg9[%c0_56, %c0_57] : memref<1x3xf32, #tpu.memory_space<vmem>>, vector<1x3xf32>
    %350 = vector.broadcast %349 : vector<1x3xf32> to vector<2x3xf32>
    %351 = arith.addf %348, %350 : vector<2x3xf32>
    %c0_58 = arith.constant 0 : index
    %c0_59 = arith.constant 0 : index
    %352 = vector.load %arg10[%c0_58, %c0_59] : memref<2x3xf32, #tpu.memory_space<vmem>>, vector<2x3xf32>
    tpu.vector_store %arg10[%c0_58, %c0_59], %351 {strides = array<i32>} : memref<2x3xf32, #tpu.memory_space<vmem>>, vector<2x3xf32>,
    return
  }
}

</mosaic_0001>

<bundles_post_ra>
// kernel: bertweet_rcnn_forward.1
= control target key start
LH: loop header
LB: loop body
LE: loop exit
PB: predicated region body
PF: predicated region fallthrough
CT: control target
= control target key end

     0   :  { %v2943_v2 = vmov 0   ;;  %s3545_s0 = inlined_call_operand.vmem [shape: s32[16,1], index: 0, kind: input, shape index: {}]   ;;  %s3546_s1 = inlined_call_operand.vmem [shape: f32[32,64], index: 1, kind: input, shape index: {}]   ;;  %s3547_s2 = inlined_call_operand.vmem [shape: f32[64,256], index: 2, kind: input, shape index: {}]   ;;  %s3548_s3 = inlined_call_operand.vmem [shape: f32[1,256], index: 3, kind: input, shape index: {}]   ;;  %s3549_s4 = inlined_call_operand.vmem [shape: f32[32,128], index: 4, kind: input, shape index: {}]   ;;  %s3550_s5 = inlined_call_operand.vmem [shape: f32[32,128], index: 5, kind: input, shape index: {}]   ;;  %s3551_s6 = inlined_call_operand.vmem [shape: f32[128,64], index: 6, kind: input, shape index: {}]   ;;  %s3552_s7 = inlined_call_operand.vmem [shape: f32[1,64], index: 7, kind: input, shape index: {}]   ;;  %s3553_s8 = inlined_call_operand.vmem [shape: f32[64,3], index: 8, kind: input, shape index: {}]   ;;  %s3554_s9 = inlined_call_operand.vmem [shape: f32[1,3], index: 9, kind: input, shape index: {}]   ;;  %s3555_s10 = inlined_call_operand.hbm [shape: f32[2,3], index: 10, kind: output, shape index: {}]  }
   0x1   :  { %v36_v0 = vld [vmem:[%s3545_s0] sm:$0xff]  ;;  %2771 = vset.pattern.permute.xlu0 %v2943_v2  ;;  %v53_v3 = vld [vmem:[%s3546_s1 + $0x8] sm:$0xff]  ;;  %v54_v4 = vld [vmem:[%s3546_s1 + $0x10] sm:$0xff] }
   0x2   :  { %v52_v1 = vld [vmem:[%s3546_s1] sm:$0xff]  ;;  %v55_v5 = vld [vmem:[%s3546_s1 + $0x18] sm:$0xff]  ;;  %41 = vperm.xlu0 %2771, %v36_v0  }
   0x3   :  { %v2599_v6 = vpack.c.bf16 %v53_v3, %v52_v1  ;;  %v2603_v7 = vpack.c.bf16 %v55_v5, %v54_v4 }
   0x4   :  { %15 = vsyncpa [#allocation3], 0  ;;  %v37_v8 = vld [vmem:[%s3545_s0 + $0x8] sm:$0xff]  ;;  %v2944_v9 = vmov 0.0   ;;  %v141_v11 = vld [vmem:[%s3547_s2 + $0x18] sm:$0xff]  ;;  %v2945_v19 = vmov 0.0|0.0   ;;  %v38_v35 = vlaneseq }
   0x5   :  { %237 = vmatprep.mubr.f32.mxu1 %v2944_v9  ;;  %2600 = vmatprep.subr.bf16.mxu0 %v2599_v6  ;;  %v139_v10 = vld [vmem:[%s3547_s2 + $0x8] sm:$0xff]  ;;  %v138_v12 = vld [vmem:[%s3547_s2] sm:$0xff]  ;;  %v140_v14 = vld [vmem:[%s3547_s2 + $0x10] sm:$0xff]  ;;  %vm56_vm0 = vcmask 261120   ;;  %vm2946_vm3 = vmmov 0   ;;  %vm166_vm4 = vcmask 523264  }
   0x6   :  { %2602 = vmatpush3.bf16.msra.mxu0 %v2599_v6  ;;  %44 = vperm.xlu0 %2771, %v37_v8   ;;  %v2607_v13 = vpack.c.bf16 %v141_v11, %v139_v10  ;;  %v143_v15 = vld [vmem:[%s3547_s2 + $0x28] sm:$0xff]  ;;  %v145_v16 = vld [vmem:[%s3547_s2 + $0x38] sm:$0xff]  ;;  %v2609_v17 = vpack.c.bf16 %v140_v14, %v138_v12  ;;  %v142_v20 = vld [vmem:[%s3547_s2 + $0x20] sm:$0xff]  ;;  %v39_v36 = vand.u32 127, %v38_v35  ;;  %v157_v60 = vshrl.u32 %v38_v35, 7  ;;  %s2948_s27 = smov 64  }
   0x7   :  { %2604 = vmatprep.subr.bf16.mxu0 %v2603_v7  ;;  %v2611_v18 = vpack.c.bf16 %v145_v16, %v143_v15  ;;  %v144_v21 = vld [vmem:[%s3547_s2 + $0x30] sm:$0xff]  ;;  %v147_v22 = vld [vmem:[%s3547_s2 + $0x48] sm:$0xff]  ;;  %v149_v23 = vld [vmem:[%s3547_s2 + $0x58] sm:$0xff]  ;;  %vm1940_vm5 = vcmask 1041408   ;;  %vm1942_vm6 = vcmask 1043456   ;;  %vm1944_vm7 = vcmask 1045504  }
   0x8   :  { %2608 = vmatprep.subr.bf16.mxu1 %v2607_v13  ;;  %v2613_v24 = vpack.c.bf16 %v144_v21, %v142_v20  ;;  %v2615_v25 = vpack.c.bf16 %v149_v23, %v147_v22  ;;  %v146_v26 = vld [vmem:[%s3547_s2 + $0x40] sm:$0xff]  ;;  %v148_v27 = vld [vmem:[%s3547_s2 + $0x50] sm:$0xff]  ;;  %v151_v28 = vld [vmem:[%s3547_s2 + $0x68] sm:$0xff]  ;;  %v162_v61 = vsub.s32 1, %v157_v60  ;;  %v158_v63 = vsub.s32 0, %v157_v60 }
   0x9   :  { %2610 = vmatpush1.bf16.msra.mxu1 %v2609_v17  ;;  %v153_v29 = vld [vmem:[%s3547_s2 + $0x78] sm:$0xff]  ;;  %v2617_v30 = vpack.c.bf16 %v148_v27, %v146_v26  ;;  %v150_v32 = vld [vmem:[%s3547_s2 + $0x60] sm:$0xff]  ;;  %v152_v33 = vld [vmem:[%s3547_s2 + $0x70] sm:$0xff]  ;;  %vm2190_vm8 = vcmask 17408  }
   0xa   :  { %2606 = vmatpush3.bf16.msra.mxu0 %v2603_v7  ;;  %2612 = vmatprep.subr.bf16.mxu1 %v2611_v18  ;;  %v2619_v31 = vpack.c.bf16 %v153_v29, %v151_v28  ;;  %v2621_v34 = vpack.c.bf16 %v152_v33, %v150_v32  ;;  %v250_v38 = vld [vmem:[%s3549_s4] sm:$0xff]  ;;  %v251_v39 = vld [vmem:[%s3549_s4 + $0x8] sm:$0xff]  ;;  %v252_v43 = vld [vmem:[%s3549_s4 + $0x10] sm:$0xff] }
   0xb   :  { %2623 = vmatprep.subr.bf16.mxu0 %v2945_v19  ;;  %v3083_v42 = vpack.c.bf16 %v251_v39, %v250_v38  ;;  %v253_v44 = vld [vmem:[%s3549_s4 + $0x18] sm:$0xff]  ;;  %v254_v47 = vld [vmem:[%s3550_s5] sm:$0xff]  ;;  %v255_v48 = vld [vmem:[%s3550_s5 + $0x8] sm:$0xff] }
   0xc   :  { %v3094_v46 = vpack.c.bf16 %v253_v44, %v252_v43  ;;  %v3106_v49 = vpack.c.bf16 %v255_v48, %v254_v47  ;;  %v256_v50 = vld [vmem:[%s3550_s5 + $0x10] sm:$0xff]  ;;  %v257_v51 = vld [vmem:[%s3550_s5 + $0x18] sm:$0xff]  ;;  %v154_v62 = vld [vmem:[%s3548_s3] sm:$0x3]  ;;  %s2947_s3 = smov 32  }
   0xd   :  { %2614 = vmatpush1.bf16.msra.mxu1 %v2613_v24  ;;  %v3120_v52 = vpack.c.bf16 %v257_v51, %v256_v50  ;;  %v163_v0 = vrot.slane %v154_v62, %v162_v61  ;;  %v159_v3 = vrot.slane %v154_v62, %v158_v63 }
   0xe   :  { %2616 = vmatprep.subr.bf16.mxu1 %v2615_v25 }
  0x11   :  { %2618 = vmatpush1.bf16.msra.mxu1 %v2617_v30 }
  0x12   :  { %2620 = vmatprep.subr.bf16.mxu1 %v2619_v31 }
  0x15   :  { %2622 = vmatpush1.bf16.msra.mxu1 %v2621_v34 }
  0x16   :  { %2635 = vmatprep.subr.bf16.mxu1 %v2945_v19 }
  0x81   :  { %v42_v37 = vpop.permute.xlu0 %41 }
  0x82   :  { %vm46_vm1 = vcmp.eq.s32.totalorder %v42_v37, %v39_v36 }
  0x83   :  { %v2206_v40 = vsel %vm46_vm1, 1.0, %v2944_v9 }
  0x84   :  { %2366 = vmatprep.mubr.msk.f32.mxu0 %vm56_vm0, %v2206_v40 }
  0x85   :  { %v45_v41 = vpop.permute.xlu0 %44 }
  0x86   :  { %vm47_vm2 = vcmp.eq.s32.totalorder %v45_v41, %v39_v36 }
  0x87   :  { %v2207_v45 = vsel %vm47_vm2, 1.0, %v2944_v9 }
  0x88   :  { %2367 = vmatmul.mubr.msk.f32.vlgmr.msra.gmra.mrb[0].mxu0 %vm56_vm0, %v2207_v45 }
  0x89   :  { %2625 = vmatpush3.bf16.msra.mxu0 %v3083_v42  ;;  %2377 = vmatprep.mubr.msk.f32.mxu0 %vm2946_vm3, %v2944_v9 }
  0x8a   :  { %2626 = vmatprep.subr.bf16.mxu0 %v2945_v19 }
  0x8d   :  { %2628 = vmatpush3.bf16.msra.mxu0 %v3094_v46 }
  0x8e   :  { %2629 = vmatprep.subr.bf16.mxu0 %v2945_v19 }
  0x90   :  { %2378 = vmatmul.mubr.f32.vlgmr.msra.gmra.mrb[2].mxu0 %v2944_v9 }
  0x91   :  { %2631 = vmatpush3.bf16.msra.mxu0 %v3106_v49  ;;  %2388 = vmatprep.mubr.msk.f32.mxu0 %vm2946_vm3, %v2944_v9 }
  0x92   :  { %2632 = vmatprep.subr.bf16.mxu0 %v2945_v19 }
  0x95   :  { %2634 = vmatpush3.bf16.msra.mxu0 %v3120_v52 }
  0x96   :  { %2641 = vmatprep.subr.bf16.mxu0 %v2945_v19 }
  0x98   :  { %2389 = vmatmul.mubr.f32.vlgmr.msra.gmra.mrb[4].mxu0 %v2944_v9 }
  0x99   :  { %2643 = vmatpush3.bf16.msra.mxu0 %v3106_v49  ;;  %2410 = vmatprep.mubr.msk.f32.mxu0 %vm2946_vm3, %v2944_v9 }
  0x9a   :  { %2644 = vmatprep.subr.bf16.mxu0 %v2945_v19 }
  0x9d   :  { %2646 = vmatpush3.bf16.msra.mxu0 %v3120_v52 }
  0x9e   :  { %2653 = vmatprep.subr.bf16.mxu0 %v2945_v19 }
 0x15b   :  { %v3131_v53 = vpop.f32.mrb[0].mxu0 }
 0x15c   :  { %v3133_v54 = vpop.f32.mrb[1].mxu0 }
 0x15d   :  { %v2782_v55 = vpack.i.bf16 %v3131_v53, %v3133_v54  ;;  %2210 = vmatmul.mubr.msk.f32.vlgmr.msra.gmra.mrb[0].mxu1 %vm166_vm4, %v3133_v54  ;;  %v2103_v54 = vld [vmem:[%s3553_s8 + $0x8] sm:$0xff] }
 0x15e   :  { %243 = vmatprep.mubr.f32.mxu1 %v2944_v9  ;;  %2637 = vmatpush3.bf16.msra.mxu1 %v3083_v42 }
 0x15f   :  { %2638 = vmatprep.subr.bf16.mxu1 %v2945_v19 }
 0x161   :  { %2211 = vmatmul.mubr.msk.f32.gmra.mrb[2].mxu1 %vm166_vm4, %v3131_v53  ;;  %v2102_v53 = vld [vmem:[%s3553_s8] sm:$0xff] }
 0x162   :  { %2640 = vmatpush3.bf16.msra.mxu1 %v3094_v46  ;;  %2399 = vmatprep.mubr.msk.f32.mxu1 %vm2946_vm3, %v2944_v9 }
 0x163   :  { %v327_v56 = vpop.f32.mrb[2].mxu0  ;;  %2647 = vmatprep.subr.bf16.mxu1 %v2945_v19 }
 0x164   :  { %v2379_v57 = vpop.f32.mrb[3].mxu0 }
 0x16b   :  { %v422_v58 = vpop.f32.mrb[4].mxu0 }
 0x16c   :  { %v2390_v59 = vpop.f32.mrb[5].mxu0  ;;  %v427_v6 = vrot.slane %v422_v58, 2 }
 0x230   :  { %v239_v1 = vpop.f32.mrb[0].mxu1 }
 0x231   :  { %v241_v2 = vpop.f32.mrb[1].mxu1  ;;  %v3155_v10 = vadd.f32 %v239_v1, %v159_v3 }
 0x232   :  { %v3151_v4 = vadd.f32 %v241_v2, %v163_v0 }
 0x233   :  { %v331_v13 = vadd.f32 %v327_v56, %v3155_v10 }
 0x234   :  { %v245_v5 = vpop.f32.mrb[2].mxu1 }
 0x235   :  { %v3153_v7 = vadd.f32 %v245_v5, %v159_v3  ;;  %v247_v8 = vpop.f32.mrb[3].mxu1  ;;  %v2212_v17 = vmul.f32 -1.442695, %v331_v13 }
 0x236   :  { %v3157_v11 = vadd.f32 %v247_v8, %v163_v0 }
 0x238   :  { %v429_v12 = vadd.f32 %v427_v6, %v3157_v11 }
 0x23a   :  { %2787 = vtanh.f32 %v429_v12  ;;  %v2213_v16 = vmul.f32 -1.442695, %v429_v12 }
 0x23b   :  { %2789 = vtanh.f32 %v331_v13 }
 0x23c   :  { %2791 = vpow2.f32 %v2213_v16 }
 0x23d   :  { %2793 = vpow2.f32 %v2212_v17 }
 0x244   :  { %v2788_v14 = vpop.eup %2787 }
 0x245   :  { %439 = vrot.lane.b32.xlu1 %v2788_v14, %s2947_s3  ;;  %v2790_v15 = vpop.eup %2789 }
 0x246   :  { %v2792_v18 = vpop.eup %2791 }
 0x247   :  { %v433_v20 = vadd.f32 1.0, %v2792_v18  ;;  %v2794_v21 = vpop.eup %2793 }
 0x248   :  { %v335_v22 = vadd.f32 1.0, %v2794_v21 }
 0x249   :  { %341 = vrot.lane.b32.xlu1 %v2790_v15, %s2947_s3  ;;  %2795 = vrcp.f32 %v433_v20 }
 0x24a   :  { %2797 = vrcp.f32 %v335_v22 }
 0x253   :  { %v2796_v23 = vpop.eup %2795 }
 0x254   :  { %v2798_v26 = vpop.eup %2797  ;;  %v437_v29 = vmul.f32 0.0, %v2796_v23 }
 0x255   :  { %v339_v32 = vmul.f32 0.0, %v2798_v26 }
 0x2b7   :  { %v440_v24 = vpop.permute.xlu1 %439 }
 0x2b8   :  { %v442_v25 = vmul.f32 %v2796_v23, %v440_v24 }
 0x2ba   :  { %444 = vrot.lane.b32.xlu0 %v442_v25, %s2947_s3 }
 0x2bb   :  { %v342_v27 = vpop.permute.xlu1 %341 }
 0x2bc   :  { %v344_v28 = vmul.f32 %v2798_v26, %v342_v27 }
 0x2be   :  { %346 = vrot.lane.b32.xlu1 %v344_v28, %s2947_s3 }
 0x32c   :  { %v445_v30 = vpop.permute.xlu0 %444 }
 0x32d   :  { %v3165_v31 = vadd.f32 %v445_v30, %v437_v29 }
 0x32f   :  { %2799 = vtanh.f32 %v3165_v31  ;;  %v648_v14 = vrot.slane %v3165_v31, 2 }
 0x330   :  { %v347_v33 = vpop.permute.xlu1 %346 }
 0x331   :  { %v3168_v34 = vadd.f32 %v347_v33, %v339_v32 }
 0x333   :  { %2801 = vtanh.f32 %v3168_v34  ;;  %v541_v16 = vrot.slane %v3168_v34, 6 }
 0x339   :  { %v2800_v35 = vpop.eup %2799 }
 0x33a   :  { %450 = vrot.lane.b32.xlu0 %v2800_v35, %s2947_s3 }
 0x33d   :  { %v2802_v36 = vpop.eup %2801 }
 0x33e   :  { %352 = vrot.lane.b32.xlu1 %v2802_v36, %s2947_s3 }
 0x3ac   :  { %v451_v37 = vpop.permute.xlu0 %450 }
 0x3ad   :  { %v3173_v38 = vmul.f32 %v2796_v23, %v451_v37 }
 0x3af   :  { %v561_v39 = vrot.slane %v3173_v38, 6 }
 0x3b0   :  { %v353_v40 = vpop.permute.xlu1 %352 }
 0x3b1   :  { %v3176_v41 = vmul.f32 %v2798_v26, %v353_v40  ;;  %562 = vrot.lane.b32.xlu0 %v561_v39, %s2948_s27 }
 0x3b3   :  { %455 = vrot.lane.b32.xlu1 %v3176_v41, %s2948_s27 }
 0x423   :  { %v563_v43 = vpop.permute.xlu0 %562 }
 0x424   :  { %2411 = vmatmul.mubr.msk.f32.vlgmr.msra.gmra.mrb[6].mxu0 %vm56_vm0, %v563_v43 }
 0x425   :  { %v456_v44 = vpop.permute.xlu1 %455  ;;  %2655 = vmatpush3.bf16.msra.mxu0 %v3106_v49  ;;  %2432 = vmatprep.mubr.msk.f32.mxu0 %vm2946_vm3, %v2944_v9 }
 0x426   :  { %2400 = vmatmul.mubr.msk.f32.vlgmr.msra.gmra.mrb[4].mxu1 %vm56_vm0, %v456_v44  ;;  %2656 = vmatprep.subr.bf16.mxu0 %v2945_v19 }
 0x427   :  { %2649 = vmatpush3.bf16.msra.mxu1 %v3083_v42  ;;  %2421 = vmatprep.mubr.msk.f32.mxu1 %vm2946_vm3, %v2944_v9 }
 0x428   :  { %2650 = vmatprep.subr.bf16.mxu1 %v2945_v19 }
 0x429   :  { %2658 = vmatpush3.bf16.msra.mxu0 %v3120_v52 }
 0x42a   :  { %2665 = vmatprep.subr.bf16.mxu0 %v2945_v19 }
 0x42b   :  { %2652 = vmatpush3.bf16.msra.mxu1 %v3094_v46 }
 0x42c   :  { %2659 = vmatprep.subr.bf16.mxu1 %v2945_v19 }
 0x4f7   :  { %v632_v45 = vpop.f32.mrb[6].mxu0 }
 0x4f8   :  { %v637_v47 = vrot.slane %v632_v45, 4  ;;  %v2412_v48 = vpop.f32.mrb[7].mxu0 }
 0x4f9   :  { %v525_v50 = vpop.f32.mrb[4].mxu1 }
 0x4fa   :  { %v639_v51 = vadd.f32 %v637_v47, %v3157_v11  ;;  %v530_v56 = vrot.slane %v525_v50, 6  ;;  %v2401_v57 = vpop.f32.mrb[5].mxu1 }
 0x4fc   :  { %2803 = vtanh.f32 %v639_v51  ;;  %v532_v58 = vadd.f32 %v530_v56, %v3155_v10  ;;  %v2217_v61 = vmul.f32 -1.442695, %v639_v51 }
 0x4fe   :  { %2805 = vtanh.f32 %v532_v58  ;;  %v2215_v62 = vmul.f32 -1.442695, %v532_v58 }
 0x4ff   :  { %2807 = vpow2.f32 %v2217_v61 }
 0x500   :  { %2809 = vpow2.f32 %v2215_v62 }
 0x506   :  { %v2804_v59 = vpop.eup %2803 }
 0x507   :  { %652 = vrot.lane.b32.xlu0 %v2804_v59, %s2947_s3 }
 0x508   :  { %v2806_v60 = vpop.eup %2805 }
 0x509   :  { %545 = vrot.lane.b32.xlu1 %v2806_v60, %s2947_s3  ;;  %v2808_v63 = vpop.eup %2807 }
 0x50a   :  { %v2810_v0 = vpop.eup %2809  ;;  %v643_v1 = vadd.f32 1.0, %v2808_v63 }
 0x50b   :  { %v536_v2 = vadd.f32 1.0, %v2810_v0 }
 0x50c   :  { %2811 = vrcp.f32 %v643_v1 }
 0x50d   :  { %2813 = vrcp.f32 %v536_v2 }
 0x516   :  { %v2812_v3 = vpop.eup %2811 }
 0x517   :  { %v2814_v8 = vpop.eup %2813  ;;  %v650_v15 = vmul.f32 %v2812_v3, %v648_v14 }
 0x518   :  { %v543_v20 = vmul.f32 %v2814_v8, %v541_v16 }
 0x579   :  { %v653_v5 = vpop.permute.xlu0 %652 }
 0x57a   :  { %v655_v6 = vmul.f32 %v2812_v3, %v653_v5 }
 0x57b   :  { %v546_v12 = vpop.permute.xlu1 %545 }
 0x57c   :  { %657 = vrot.lane.b32.xlu0 %v655_v6, %s2947_s3  ;;  %v548_v13 = vmul.f32 %v2814_v8, %v546_v12 }
 0x57e   :  { %550 = vrot.lane.b32.xlu1 %v548_v13, %s2947_s3 }
 0x5ee   :  { %v658_v17 = vpop.permute.xlu0 %657 }
 0x5ef   :  { %v3203_v18 = vadd.f32 %v658_v17, %v650_v15 }
 0x5f0   :  { %v551_v21 = vpop.permute.xlu1 %550 }
 0x5f1   :  { %2815 = vtanh.f32 %v3203_v18  ;;  %v3206_v22 = vadd.f32 %v551_v21, %v543_v20  ;;  %v862_v0 = vrot.slane %v3203_v18, 2 }
 0x5f3   :  { %2817 = vtanh.f32 %v3206_v22  ;;  %v755_v2 = vrot.slane %v3206_v22, 6 }
 0x5fb   :  { %v2816_v23 = vpop.eup %2815 }
 0x5fc   :  { %663 = vrot.lane.b32.xlu0 %v2816_v23, %s2947_s3 }
 0x5fd   :  { %v2818_v24 = vpop.eup %2817 }
 0x5fe   :  { %556 = vrot.lane.b32.xlu1 %v2818_v24, %s2947_s3 }
 0x66e   :  { %v664_v25 = vpop.permute.xlu0 %663 }
 0x66f   :  { %v3211_v26 = vmul.f32 %v2812_v3, %v664_v25 }
 0x670   :  { %v557_v28 = vpop.permute.xlu1 %556 }
 0x671   :  { %v775_v27 = vrot.slane %v3211_v26, 4  ;;  %v3214_v29 = vmul.f32 %v2814_v8, %v557_v28 }
 0x673   :  { %776 = vrot.lane.b32.xlu0 %v775_v27, %s2948_s27  ;;  %v668_v30 = vrot.slane %v3214_v29, 2  ;;  %v1941_v21 = vsel %vm1940_vm5, %v3176_v41, %v3214_v29 }
 0x675   :  { %669 = vrot.lane.b32.xlu1 %v668_v30, %s2948_s27 }
 0x6e5   :  { %v777_v31 = vpop.permute.xlu0 %776 }
 0x6e6   :  { %2433 = vmatmul.mubr.msk.f32.vlgmr.msra.gmra.mrb[8].mxu0 %vm56_vm0, %v777_v31 }
 0x6e7   :  { %2667 = vmatpush3.bf16.msra.mxu0 %v3106_v49  ;;  %2454 = vmatprep.mubr.msk.f32.mxu0 %vm2946_vm3, %v2944_v9  ;;  %v670_v32 = vpop.permute.xlu1 %669 }
 0x6e8   :  { %2668 = vmatprep.subr.bf16.mxu0 %v2945_v19  ;;  %2422 = vmatmul.mubr.msk.f32.vlgmr.msra.gmra.mrb[6].mxu1 %vm56_vm0, %v670_v32 }
 0x6e9   :  { %2661 = vmatpush3.bf16.msra.mxu1 %v3083_v42  ;;  %2443 = vmatprep.mubr.msk.f32.mxu1 %vm2946_vm3, %v2944_v9 }
 0x6ea   :  { %2662 = vmatprep.subr.bf16.mxu1 %v2945_v19 }
 0x6eb   :  { %2670 = vmatpush3.bf16.msra.mxu0 %v3120_v52 }
 0x6ec   :  { %2677 = vmatprep.subr.bf16.mxu0 %v2945_v19 }
 0x6ed   :  { %2664 = vmatpush3.bf16.msra.mxu1 %v3094_v46 }
 0x6ee   :  { %2671 = vmatprep.subr.bf16.mxu1 %v2945_v19 }
 0x7b9   :  { %v846_v33 = vpop.f32.mrb[8].mxu0 }
 0x7ba   :  { %v851_v34 = vrot.slane %v846_v33, 6  ;;  %v2434_v35 = vpop.f32.mrb[9].mxu0 }
 0x7bb   :  { %v739_v37 = vpop.f32.mrb[6].mxu1 }
 0x7bc   :  { %v853_v36 = vadd.f32 %v851_v34, %v3157_v11  ;;  %v744_v39 = vrot.slane %v739_v37, 4  ;;  %v2423_v40 = vpop.f32.mrb[7].mxu1 }
 0x7be   :  { %2819 = vtanh.f32 %v853_v36  ;;  %v746_v43 = vadd.f32 %v744_v39, %v3155_v10  ;;  %v2221_v47 = vmul.f32 -1.442695, %v853_v36 }
 0x7c0   :  { %2821 = vtanh.f32 %v746_v43  ;;  %v2219_v48 = vmul.f32 -1.442695, %v746_v43 }
 0x7c1   :  { %2823 = vpow2.f32 %v2221_v47 }
 0x7c2   :  { %2825 = vpow2.f32 %v2219_v48 }
 0x7c8   :  { %v2820_v44 = vpop.eup %2819 }
 0x7c9   :  { %866 = vrot.lane.b32.xlu0 %v2820_v44, %s2947_s3 }
 0x7ca   :  { %v2822_v45 = vpop.eup %2821 }
 0x7cb   :  { %759 = vrot.lane.b32.xlu1 %v2822_v45, %s2947_s3  ;;  %v2824_v50 = vpop.eup %2823 }
 0x7cc   :  { %v2826_v51 = vpop.eup %2825  ;;  %v857_v56 = vadd.f32 1.0, %v2824_v50 }
 0x7cd   :  { %v750_v57 = vadd.f32 1.0, %v2826_v51 }
 0x7ce   :  { %2827 = vrcp.f32 %v857_v56 }
 0x7cf   :  { %2829 = vrcp.f32 %v750_v57 }
 0x7d8   :  { %v2828_v58 = vpop.eup %2827 }
 0x7d9   :  { %v2830_v61 = vpop.eup %2829  ;;  %v864_v1 = vmul.f32 %v2828_v58, %v862_v0 }
 0x7da   :  { %v757_v6 = vmul.f32 %v2830_v61, %v755_v2 }
 0x83b   :  { %v867_v59 = vpop.permute.xlu0 %866 }
 0x83c   :  { %v869_v60 = vmul.f32 %v2828_v58, %v867_v59 }
 0x83d   :  { %v760_v62 = vpop.permute.xlu1 %759 }
 0x83e   :  { %871 = vrot.lane.b32.xlu0 %v869_v60, %s2947_s3  ;;  %v762_v63 = vmul.f32 %v2830_v61, %v760_v62 }
 0x840   :  { %764 = vrot.lane.b32.xlu1 %v762_v63, %s2947_s3 }
 0x8b0   :  { %v872_v3 = vpop.permute.xlu0 %871 }
 0x8b1   :  { %v3241_v5 = vadd.f32 %v872_v3, %v864_v1 }
 0x8b2   :  { %v765_v8 = vpop.permute.xlu1 %764 }
 0x8b3   :  { %2831 = vtanh.f32 %v3241_v5  ;;  %v3244_v12 = vadd.f32 %v765_v8, %v757_v6  ;;  %v1073_v50 = vrot.slane %v3241_v5, 2 }
 0x8b5   :  { %2833 = vtanh.f32 %v3244_v12 }
 0x8bd   :  { %v2832_v13 = vpop.eup %2831 }
 0x8be   :  { %877 = vrot.lane.b32.xlu0 %v2832_v13, %s2947_s3 }
 0x8bf   :  { %v2834_v14 = vpop.eup %2833 }
 0x8c0   :  { %770 = vrot.lane.b32.xlu1 %v2834_v14, %s2947_s3 }
 0x930   :  { %v878_v15 = vpop.permute.xlu0 %877 }
 0x931   :  { %v3249_v16 = vmul.f32 %v2828_v58, %v878_v15  ;;  %v969_v58 = vrot.slane %v3244_v12, 6 }
 0x932   :  { %v771_v18 = vpop.permute.xlu1 %770 }
 0x933   :  { %v989_v17 = vrot.slane %v3249_v16, 2  ;;  %v773_v20 = vmul.f32 %v2830_v61, %v771_v18 }
 0x935   :  { %990 = vrot.lane.b32.xlu0 %v989_v17, %s2948_s27  ;;  %v882_v22 = vrot.slane %v773_v20, 4  ;;  %v3257_v23 = vsel %vm1942_vm6, %v1941_v21, %v773_v20 }
 0x937   :  { %883 = vrot.lane.b32.xlu1 %v882_v22, %s2948_s27 }
 0x9a7   :  { %v991_v24 = vpop.permute.xlu0 %990 }
 0x9a8   :  { %2455 = vmatmul.mubr.msk.f32.vlgmr.msra.gmra.mrb[10].mxu0 %vm56_vm0, %v991_v24 }
 0x9a9   :  { %2679 = vmatpush3.bf16.msra.mxu0 %v3106_v49  ;;  %2476 = vmatprep.mubr.msk.f32.mxu0 %vm2946_vm3, %v2944_v9  ;;  %v884_v25 = vpop.permute.xlu1 %883 }
 0x9aa   :  { %2680 = vmatprep.subr.bf16.mxu0 %v2945_v19  ;;  %2444 = vmatmul.mubr.msk.f32.vlgmr.msra.gmra.mrb[8].mxu1 %vm56_vm0, %v884_v25 }
 0x9ab   :  { %2673 = vmatpush3.bf16.msra.mxu1 %v3083_v42  ;;  %2465 = vmatprep.mubr.msk.f32.mxu1 %vm2946_vm3, %v2944_v9 }
 0x9ac   :  { %2674 = vmatprep.subr.bf16.mxu1 %v2945_v19 }
 0x9ad   :  { %2682 = vmatpush3.bf16.msra.mxu0 %v3120_v52 }
 0x9ae   :  { %2689 = vmatprep.subr.bf16.mxu0 %v2945_v19 }
 0x9af   :  { %2676 = vmatpush3.bf16.msra.mxu1 %v3094_v46 }
 0x9b0   :  { %2683 = vmatprep.subr.bf16.mxu1 %v2945_v19 }
 0xa7b   :  { %v1060_v41 = vpop.f32.mrb[10].mxu0 }
 0xa7c   :  { %v1064_v27 = vadd.f32 %v1060_v41, %v3157_v11  ;;  %v2456_v28 = vpop.f32.mrb[11].mxu0 }
 0xa7d   :  { %v953_v29 = vpop.f32.mrb[8].mxu1 }
 0xa7e   :  { %2835 = vtanh.f32 %v1064_v27  ;;  %v958_v30 = vrot.slane %v953_v29, 2  ;;  %v2445_v31 = vpop.f32.mrb[9].mxu1  ;;  %v2225_v35 = vmul.f32 -1.442695, %v1064_v27 }
 0xa80   :  { %v960_v32 = vadd.f32 %v958_v30, %v3155_v10 }
 0xa82   :  { %2837 = vtanh.f32 %v960_v32  ;;  %v2223_v36 = vmul.f32 -1.442695, %v960_v32 }
 0xa83   :  { %2839 = vpow2.f32 %v2225_v35 }
 0xa84   :  { %2841 = vpow2.f32 %v2223_v36 }
 0xa88   :  { %v2836_v33 = vpop.eup %2835 }
 0xa89   :  { %1077 = vrot.lane.b32.xlu0 %v2836_v33, %s2947_s3 }
 0xa8c   :  { %v2838_v34 = vpop.eup %2837 }
 0xa8d   :  { %973 = vrot.lane.b32.xlu1 %v2838_v34, %s2947_s3  ;;  %v2840_v37 = vpop.eup %2839 }
 0xa8e   :  { %v1068_v11 = vadd.f32 1.0, %v2840_v37  ;;  %v2842_v39 = vpop.eup %2841 }
 0xa8f   :  { %v964_v40 = vadd.f32 1.0, %v2842_v39 }
 0xa90   :  { %2843 = vrcp.f32 %v1068_v11 }
 0xa91   :  { %2845 = vrcp.f32 %v964_v40 }
 0xa9a   :  { %v2844_v43 = vpop.eup %2843 }
 0xa9b   :  { %v2846_v45 = vpop.eup %2845  ;;  %v1075_v51 = vmul.f32 %v2844_v43, %v1073_v50 }
 0xa9c   :  { %v971_v59 = vmul.f32 %v2846_v45, %v969_v58 }
 0xafb   :  { %v1078_v44 = vpop.permute.xlu0 %1077 }
 0xafc   :  { %v1080_v10 = vmul.f32 %v2844_v43, %v1078_v44 }
 0xafe   :  { %1082 = vrot.lane.b32.xlu0 %v1080_v10, %s2947_s3 }
 0xaff   :  { %v974_v47 = vpop.permute.xlu1 %973 }
 0xb00   :  { %v976_v48 = vmul.f32 %v2846_v45, %v974_v47 }
 0xb02   :  { %978 = vrot.lane.b32.xlu1 %v976_v48, %s2947_s3 }
 0xb70   :  { %v1083_v56 = vpop.permute.xlu0 %1082 }
 0xb71   :  { %v3281_v57 = vadd.f32 %v1083_v56, %v1075_v51 }
 0xb73   :  { %2847 = vtanh.f32 %v3281_v57  ;;  %v1283_v36 = vrot.slane %v3281_v57, 2 }
 0xb74   :  { %v979_v60 = vpop.permute.xlu1 %978 }
 0xb75   :  { %v3285_v61 = vadd.f32 %v979_v60, %v971_v59 }
 0xb77   :  { %2849 = vtanh.f32 %v3285_v61  ;;  %v1177_v40 = vrot.slane %v3285_v61, 6 }
 0xb7d   :  { %v2848_v62 = vpop.eup %2847 }
 0xb7e   :  { %1088 = vrot.lane.b32.xlu0 %v2848_v62, %s2947_s3 }
 0xb81   :  { %v2850_v63 = vpop.eup %2849 }
 0xb82   :  { %984 = vrot.lane.b32.xlu1 %v2850_v63, %s2947_s3 }
 0xbf0   :  { %v1089_v0 = vpop.permute.xlu0 %1088 }
 0xbf1   :  { %v3290_v1 = vmul.f32 %v2844_v43, %v1089_v0 }
 0xbf3   :  { %1197 = vrot.lane.b32.xlu0 %v3290_v1, %s2948_s27 }
 0xbf4   :  { %v985_v2 = vpop.permute.xlu1 %984 }
 0xbf5   :  { %v987_v3 = vmul.f32 %v2846_v45, %v985_v2 }
 0xbf7   :  { %v1093_v5 = vrot.slane %v987_v3, 6  ;;  %v3296_v6 = vsel %vm1944_vm7, %v3257_v23, %v987_v3 }
 0xbf9   :  { %1094 = vrot.lane.b32.xlu1 %v1093_v5, %s2948_s27 }
 0xc65   :  { %v1198_v8 = vpop.permute.xlu0 %1197 }
 0xc66   :  { %2477 = vmatmul.mubr.msk.f32.vlgmr.msra.gmra.mrb[12].mxu0 %vm56_vm0, %v1198_v8 }
 0xc67   :  { %2691 = vmatpush3.bf16.msra.mxu0 %v3106_v49  ;;  %2498 = vmatprep.mubr.msk.f32.mxu0 %vm2946_vm3, %v2944_v9 }
 0xc68   :  { %2692 = vmatprep.subr.bf16.mxu0 %v2945_v19 }
 0xc6b   :  { %2694 = vmatpush3.bf16.msra.mxu0 %v3120_v52  ;;  %v1095_v12 = vpop.permute.xlu1 %1094 }
 0xc6c   :  { %2701 = vmatprep.subr.bf16.mxu0 %v2945_v19  ;;  %2466 = vmatmul.mubr.msk.f32.vlgmr.msra.gmra.mrb[10].mxu1 %vm56_vm0, %v1095_v12 }
 0xc6d   :  { %2685 = vmatpush3.bf16.msra.mxu1 %v3083_v42  ;;  %2487 = vmatprep.mubr.msk.f32.mxu1 %vm2946_vm3, %v2944_v9 }
 0xc6e   :  { %2686 = vmatprep.subr.bf16.mxu1 %v2945_v19 }
 0xc71   :  { %2688 = vmatpush3.bf16.msra.mxu1 %v3094_v46 }
 0xc72   :  { %2695 = vmatprep.subr.bf16.mxu1 %v2945_v19 }
 0xd39   :  { %v1267_v13 = vpop.f32.mrb[12].mxu0 }
 0xd3a   :  { %v1272_v14 = vrot.slane %v1267_v13, 2  ;;  %v2478_v15 = vpop.f32.mrb[13].mxu0 }
 0xd3c   :  { %v1274_v17 = vadd.f32 %v1272_v14, %v3151_v4 }
 0xd3e   :  { %2851 = vtanh.f32 %v1274_v17  ;;  %v2229_v24 = vmul.f32 -1.442695, %v1274_v17 }
 0xd3f   :  { %v1164_v18 = vpop.f32.mrb[10].mxu1 }
 0xd40   :  { %v1168_v20 = vadd.f32 %v1164_v18, %v3153_v7  ;;  %v2467_v21 = vpop.f32.mrb[11].mxu1 }
 0xd42   :  { %2853 = vtanh.f32 %v1168_v20  ;;  %v2227_v25 = vmul.f32 -1.442695, %v1168_v20 }
 0xd43   :  { %2855 = vpow2.f32 %v2229_v24 }
 0xd44   :  { %2857 = vpow2.f32 %v2227_v25 }
 0xd48   :  { %v2852_v22 = vpop.eup %2851 }
 0xd49   :  { %1287 = vrot.lane.b32.xlu0 %v2852_v22, %s2947_s3 }
 0xd4c   :  { %v2854_v23 = vpop.eup %2853 }
 0xd4d   :  { %1181 = vrot.lane.b32.xlu1 %v2854_v23, %s2947_s3  ;;  %v2856_v41 = vpop.eup %2855 }
 0xd4e   :  { %v1278_v27 = vadd.f32 1.0, %v2856_v41  ;;  %v2858_v28 = vpop.eup %2857 }
 0xd4f   :  { %v1172_v29 = vadd.f32 1.0, %v2858_v28 }
 0xd50   :  { %2859 = vrcp.f32 %v1278_v27 }
 0xd51   :  { %2861 = vrcp.f32 %v1172_v29 }
 0xd5a   :  { %v2860_v30 = vpop.eup %2859 }
 0xd5b   :  { %v2862_v33 = vpop.eup %2861  ;;  %v1285_v37 = vmul.f32 %v2860_v30, %v1283_v36 }
 0xd5c   :  { %v1179_v43 = vmul.f32 %v2862_v33, %v1177_v40 }
 0xdbb   :  { %v1288_v31 = vpop.permute.xlu0 %1287 }
 0xdbc   :  { %v1290_v32 = vmul.f32 %v2860_v30, %v1288_v31 }
 0xdbe   :  { %1292 = vrot.lane.b32.xlu0 %v1290_v32, %s2947_s3 }
 0xdbf   :  { %v1182_v34 = vpop.permute.xlu1 %1181 }
 0xdc0   :  { %v1184_v35 = vmul.f32 %v2862_v33, %v1182_v34 }
 0xdc2   :  { %1186 = vrot.lane.b32.xlu1 %v1184_v35, %s2947_s3 }
 0xe30   :  { %v1293_v11 = vpop.permute.xlu0 %1292 }
 0xe31   :  { %v3320_v39 = vadd.f32 %v1293_v11, %v1285_v37 }
 0xe33   :  { %2863 = vtanh.f32 %v3320_v39  ;;  %v1496_v27 = vrot.slane %v3320_v39, 2 }
 0xe34   :  { %v1187_v44 = vpop.permute.xlu1 %1186 }
 0xe35   :  { %v3324_v10 = vadd.f32 %v1187_v44, %v1179_v43 }
 0xe37   :  { %2865 = vtanh.f32 %v3324_v10  ;;  %v1389_v29 = vrot.slane %v3324_v10, 6 }
 0xe3d   :  { %v2864_v45 = vpop.eup %2863 }
 0xe3e   :  { %1298 = vrot.lane.b32.xlu0 %v2864_v45, %s2947_s3 }
 0xe41   :  { %v2866_v47 = vpop.eup %2865 }
 0xe42   :  { %1192 = vrot.lane.b32.xlu1 %v2866_v47, %s2947_s3 }
 0xeb0   :  { %v1299_v48 = vpop.permute.xlu0 %1298 }
 0xeb1   :  { %v3329_v50 = vmul.f32 %v2860_v30, %v1299_v48 }
 0xeb3   :  { %v1409_v51 = vrot.slane %v3329_v50, 6 }
 0xeb4   :  { %v1193_v56 = vpop.permute.xlu1 %1192 }
 0xeb5   :  { %1410 = vrot.lane.b32.xlu0 %v1409_v51, %s2948_s27  ;;  %v3333_v57 = vmul.f32 %v2862_v33, %v1193_v56 }
 0xeb7   :  { %1303 = vrot.lane.b32.xlu1 %v3333_v57, %s2948_s27 }
 0xf27   :  { %v1411_v58 = vpop.permute.xlu0 %1410 }
 0xf28   :  { %2499 = vmatmul.mubr.msk.f32.vlgmr.msra.gmra.mrb[14].mxu0 %vm56_vm0, %v1411_v58 }
 0xf29   :  { %2703 = vmatpush3.bf16.msra.mxu0 %v3106_v49  ;;  %2520 = vmatprep.mubr.msk.f32.mxu0 %vm2946_vm3, %v2944_v9  ;;  %v1304_v59 = vpop.permute.xlu1 %1303 }
 0xf2a   :  { %2704 = vmatprep.subr.bf16.mxu0 %v2945_v19  ;;  %2488 = vmatmul.mubr.msk.f32.vlgmr.msra.gmra.mrb[12].mxu1 %vm56_vm0, %v1304_v59 }
 0xf2b   :  { %2697 = vmatpush3.bf16.msra.mxu1 %v3083_v42  ;;  %2509 = vmatprep.mubr.msk.f32.mxu1 %vm2946_vm3, %v2944_v9 }
 0xf2c   :  { %2698 = vmatprep.subr.bf16.mxu1 %v2945_v19 }
 0xf2d   :  { %2706 = vmatpush3.bf16.msra.mxu0 %v3120_v52 }
 0xf2e   :  { %2713 = vmatprep.subr.bf16.mxu0 %v2945_v19 }
 0xf2f   :  { %2700 = vmatpush3.bf16.msra.mxu1 %v3094_v46 }
 0xf30   :  { %2707 = vmatprep.subr.bf16.mxu1 %v2945_v19 }
 0xffb   :  { %v1480_v60 = vpop.f32.mrb[14].mxu0 }
 0xffc   :  { %v1485_v61 = vrot.slane %v1480_v60, 4  ;;  %v2500_v62 = vpop.f32.mrb[15].mxu0 }
 0xffd   :  { %v1373_v0 = vpop.f32.mrb[12].mxu1 }
 0xffe   :  { %v1487_v63 = vadd.f32 %v1485_v61, %v3151_v4  ;;  %v1378_v2 = vrot.slane %v1373_v0, 6  ;;  %v2489_v3 = vpop.f32.mrb[13].mxu1 }
0x1000   :  { %2867 = vtanh.f32 %v1487_v63  ;;  %v1380_v5 = vadd.f32 %v1378_v2, %v3153_v7  ;;  %v2233_v13 = vmul.f32 -1.442695, %v1487_v63 }
0x1002   :  { %2869 = vtanh.f32 %v1380_v5  ;;  %v2231_v14 = vmul.f32 -1.442695, %v1380_v5 }
0x1003   :  { %2871 = vpow2.f32 %v2233_v13 }
0x1004   :  { %2873 = vpow2.f32 %v2231_v14 }
0x100a   :  { %v2868_v8 = vpop.eup %2867 }
0x100b   :  { %1500 = vrot.lane.b32.xlu0 %v2868_v8, %s2947_s3 }
0x100c   :  { %v2870_v12 = vpop.eup %2869 }
0x100d   :  { %1393 = vrot.lane.b32.xlu1 %v2870_v12, %s2947_s3  ;;  %v2872_v15 = vpop.eup %2871 }
0x100e   :  { %v2874_v17 = vpop.eup %2873  ;;  %v1491_v18 = vadd.f32 1.0, %v2872_v15 }
0x100f   :  { %v1384_v20 = vadd.f32 1.0, %v2874_v17 }
0x1010   :  { %2875 = vrcp.f32 %v1491_v18 }
0x1011   :  { %2877 = vrcp.f32 %v1384_v20 }
0x101a   :  { %v2876_v21 = vpop.eup %2875 }
0x101b   :  { %v2878_v24 = vpop.eup %2877  ;;  %v1498_v28 = vmul.f32 %v2876_v21, %v1496_v27 }
0x101c   :  { %v1391_v32 = vmul.f32 %v2878_v24, %v1389_v29 }
0x107d   :  { %v1501_v22 = vpop.permute.xlu0 %1500 }
0x107e   :  { %v1503_v23 = vmul.f32 %v2876_v21, %v1501_v22 }
0x107f   :  { %v1394_v25 = vpop.permute.xlu1 %1393 }
0x1080   :  { %1505 = vrot.lane.b32.xlu0 %v1503_v23, %s2947_s3  ;;  %v1396_v41 = vmul.f32 %v2878_v24, %v1394_v25 }
0x1082   :  { %1398 = vrot.lane.b32.xlu1 %v1396_v41, %s2947_s3 }
0x10f2   :  { %v1506_v30 = vpop.permute.xlu0 %1505 }
0x10f3   :  { %v3359_v31 = vadd.f32 %v1506_v30, %v1498_v28 }
0x10f4   :  { %v1399_v33 = vpop.permute.xlu1 %1398 }
0x10f5   :  { %2879 = vtanh.f32 %v3359_v31  ;;  %v3362_v34 = vadd.f32 %v1399_v33, %v1391_v32  ;;  %v1710_v15 = vrot.slane %v3359_v31, 2 }
0x10f7   :  { %2881 = vtanh.f32 %v3362_v34  ;;  %v1603_v18 = vrot.slane %v3362_v34, 6 }
0x10ff   :  { %v2880_v35 = vpop.eup %2879 }
0x1100   :  { %1511 = vrot.lane.b32.xlu0 %v2880_v35, %s2947_s3 }
0x1101   :  { %v2882_v36 = vpop.eup %2881 }
0x1102   :  { %1404 = vrot.lane.b32.xlu1 %v2882_v36, %s2947_s3 }
0x1172   :  { %v1512_v37 = vpop.permute.xlu0 %1511 }
0x1173   :  { %v3367_v11 = vmul.f32 %v2876_v21, %v1512_v37 }
0x1174   :  { %v1405_v40 = vpop.permute.xlu1 %1404 }
0x1175   :  { %v1623_v39 = vrot.slane %v3367_v11, 4  ;;  %v3370_v43 = vmul.f32 %v2878_v24, %v1405_v40 }
0x1177   :  { %1624 = vrot.lane.b32.xlu0 %v1623_v39, %s2948_s27  ;;  %v1516_v44 = vrot.slane %v3370_v43, 2  ;;  %v1946_v32 = vsel %vm1940_vm5, %v3333_v57, %v3370_v43 }
0x1179   :  { %1517 = vrot.lane.b32.xlu1 %v1516_v44, %s2948_s27 }
0x11e9   :  { %v1625_v10 = vpop.permute.xlu0 %1624 }
0x11ea   :  { %2521 = vmatmul.mubr.msk.f32.vlgmr.msra.gmra.mrb[16].mxu0 %vm56_vm0, %v1625_v10 }
0x11eb   :  { %2715 = vmatpush3.bf16.msra.mxu0 %v3106_v49  ;;  %2542 = vmatprep.mubr.msk.f32.mxu0 %vm2946_vm3, %v2944_v9  ;;  %v1518_v45 = vpop.permute.xlu1 %1517 }
0x11ec   :  { %2716 = vmatprep.subr.bf16.mxu0 %v2945_v19  ;;  %2510 = vmatmul.mubr.msk.f32.vlgmr.msra.gmra.mrb[14].mxu1 %vm56_vm0, %v1518_v45 }
0x11ed   :  { %2709 = vmatpush3.bf16.msra.mxu1 %v3083_v42  ;;  %2531 = vmatprep.mubr.msk.f32.mxu1 %vm2946_vm3, %v2944_v9 }
0x11ee   :  { %2710 = vmatprep.subr.bf16.mxu1 %v2945_v19 }
0x11ef   :  { %2718 = vmatpush3.bf16.msra.mxu0 %v3120_v52 }
0x11f0   :  { %2751 = vmatprep.subr.bf16.mxu0 %v2945_v19 }
0x11f1   :  { %2712 = vmatpush3.bf16.msra.mxu1 %v3094_v46 }
0x12bd   :  { %v1694_v49 = vpop.f32.mrb[16].mxu0 }
0x12be   :  { %v1699_v47 = vrot.slane %v1694_v49, 6  ;;  %v2522_v48 = vpop.f32.mrb[17].mxu0 }
0x12bf   :  { %v1587_v56 = vpop.f32.mrb[14].mxu1 }
0x12c0   :  { %v1701_v51 = vadd.f32 %v1699_v47, %v3151_v4  ;;  %v1592_v58 = vrot.slane %v1587_v56, 4  ;;  %v2511_v59 = vpop.f32.mrb[15].mxu1 }
0x12c2   :  { %2883 = vtanh.f32 %v1701_v51  ;;  %v1594_v42 = vadd.f32 %v1592_v58, %v3153_v7  ;;  %v2237_v61 = vmul.f32 -1.442695, %v1701_v51 }
0x12c4   :  { %2885 = vtanh.f32 %v1594_v42  ;;  %v2235_v46 = vmul.f32 -1.442695, %v1594_v42 }
0x12c5   :  { %2887 = vpow2.f32 %v2237_v61 }
0x12c6   :  { %2889 = vpow2.f32 %v2235_v46 }
0x12cc   :  { %v2884_v60 = vpop.eup %2883 }
0x12cd   :  { %1714 = vrot.lane.b32.xlu0 %v2884_v60, %s2947_s3 }
0x12ce   :  { %v2886_v52 = vpop.eup %2885 }
0x12cf   :  { %1607 = vrot.lane.b32.xlu1 %v2886_v52, %s2947_s3  ;;  %v2888_v62 = vpop.eup %2887 }
0x12d0   :  { %v2890_v63 = vpop.eup %2889  ;;  %v1705_v0 = vadd.f32 1.0, %v2888_v62 }
0x12d1   :  { %v1598_v2 = vadd.f32 1.0, %v2890_v63 }
0x12d2   :  { %2891 = vrcp.f32 %v1705_v0 }
0x12d3   :  { %2893 = vrcp.f32 %v1598_v2 }
0x12dc   :  { %v2892_v3 = vpop.eup %2891 }
0x12dd   :  { %v2894_v12 = vpop.eup %2893  ;;  %v1712_v17 = vmul.f32 %v2892_v3, %v1710_v15 }
0x12de   :  { %v1605_v22 = vmul.f32 %v2894_v12, %v1603_v18 }
0x133f   :  { %v1715_v5 = vpop.permute.xlu0 %1714 }
0x1340   :  { %v1717_v8 = vmul.f32 %v2892_v3, %v1715_v5 }
0x1341   :  { %v1608_v13 = vpop.permute.xlu1 %1607 }
0x1342   :  { %1719 = vrot.lane.b32.xlu0 %v1717_v8, %s2947_s3  ;;  %v1610_v14 = vmul.f32 %v2894_v12, %v1608_v13  ;;  %v1982_v13 = vld [vmem:[%s3551_s6 + $0x8] sm:$0xff] }
0x1344   :  { %1612 = vrot.lane.b32.xlu1 %v1610_v14, %s2947_s3  ;;  %v1983_v14 = vld [vmem:[%s3551_s6 + $0x10] sm:$0xff] }
0x13b4   :  { %v1720_v20 = vpop.permute.xlu0 %1719 }
0x13b5   :  { %v1722_v21 = vadd.f32 %v1720_v20, %v1712_v17  ;;  %v1984_v17 = vld [vmem:[%s3551_s6 + $0x18] sm:$0xff]  ;;  %v1985_v20 = vld [vmem:[%s3551_s6 + $0x20] sm:$0xff] }
0x13b6   :  { %v1613_v23 = vpop.permute.xlu1 %1612  ;;  %v2723_v18 = vpack.c.bf16 %v1984_v17, %v1983_v14 }
0x13b7   :  { %2895 = vtanh.f32 %v1722_v21  ;;  %v1615_v24 = vadd.f32 %v1613_v23, %v1605_v22  ;;  %v1921_v61 = vrot.slane %v1722_v21, 2  ;;  %v1986_v21 = vld [vmem:[%s3551_s6 + $0x28] sm:$0xff] }
0x13b8   :  { %v2727_v23 = vpack.c.bf16 %v1986_v21, %v1985_v20 }
0x13b9   :  { %2897 = vtanh.f32 %v1615_v24  ;;  %v1817_v0 = vrot.slane %v1615_v24, 6  ;;  %v1987_v24 = vld [vmem:[%s3551_s6 + $0x30] sm:$0xff] }
0x13c1   :  { %v2896_v25 = vpop.eup %2895 }
0x13c2   :  { %1725 = vrot.lane.b32.xlu0 %v2896_v25, %s2947_s3  ;;  %v1988_v25 = vld [vmem:[%s3551_s6 + $0x38] sm:$0xff] }
0x13c3   :  { %v2898_v41 = vpop.eup %2897 }
0x13c4   :  { %1618 = vrot.lane.b32.xlu1 %v2898_v41, %s2947_s3  ;;  %v2731_v41 = vpack.c.bf16 %v1988_v25, %v1987_v24 }
0x1434   :  { %v1726_v27 = vpop.permute.xlu0 %1725 }
0x1435   :  { %v3398_v28 = vmul.f32 %v2892_v3, %v1726_v27  ;;  %v1989_v27 = vld [vmem:[%s3551_s6 + $0x40] sm:$0xff] }
0x1436   :  { %v1619_v30 = vpop.permute.xlu1 %1618 }
0x1437   :  { %v1837_v29 = vrot.slane %v3398_v28, 2  ;;  %v1621_v31 = vmul.f32 %v2894_v12, %v1619_v30  ;;  %v1981_v12 = vld [vmem:[%s3551_s6] sm:$0xff] }
0x1438   :  { %v2719_v15 = vpack.c.bf16 %v1982_v13, %v1981_v12  ;;  %v2242_v12 = vld [vmem:[%s3552_s7] ss:$0 sm:$0xff] }
0x1439   :  { %1838 = vrot.lane.b32.xlu0 %v1837_v29, %s2948_s27  ;;  %v1730_v33 = vrot.slane %v1621_v31, 4  ;;  %v3406_v34 = vsel %vm1942_vm6, %v1946_v32, %v1621_v31  ;;  %v1990_v29 = vld [vmem:[%s3551_s6 + $0x48] sm:$0xff]  ;;  %v1991_v31 = vld [vmem:[%s3551_s6 + $0x50] sm:$0xff]  ;;  %v1992_v32 = vld [vmem:[%s3551_s6 + $0x58] sm:$0xff] }
0x143a   :  { %2720 = vmatprep.subr.bf16.mxu1 %v2719_v15  ;;  %v2735_v30 = vpack.c.bf16 %v1990_v29, %v1989_v27 }
0x143b   :  { %1731 = vrot.lane.b32.xlu1 %v1730_v33, %s2948_s27  ;;  %v2739_v33 = vpack.c.bf16 %v1992_v32, %v1991_v31 }
0x14ab   :  { %v1839_v35 = vpop.permute.xlu0 %1838 }
0x14ac   :  { %2543 = vmatmul.mubr.msk.f32.vlgmr.msra.gmra.mrb[18].mxu0 %vm56_vm0, %v1839_v35  ;;  %v1993_v35 = vld [vmem:[%s3551_s6 + $0x60] sm:$0xff] }
0x14ad   :  { %2596 = vmatprep.mubr.msk.f32.mxu0 %vm2946_vm3, %v2944_v9  ;;  %v1732_v36 = vpop.permute.xlu1 %1731 }
0x14ae   :  { %2532 = vmatmul.mubr.msk.f32.vlgmr.msra.gmra.mrb[16].mxu1 %vm56_vm0, %v1732_v36  ;;  %v1994_v36 = vld [vmem:[%s3551_s6 + $0x68] sm:$0xff] }
0x14af   :  { %2722 = vmatpush3.bf16.msra.mxu1 %v2719_v15 }
0x14b0   :  { %2724 = vmatprep.subr.bf16.mxu1 %v2723_v18 }
0x14b3   :  { %2726 = vmatpush3.bf16.msra.mxu1 %v2723_v18 }
0x14b4   :  { %2728 = vmatprep.subr.bf16.mxu1 %v2727_v23 }
0x14b7   :  { %2730 = vmatpush3.bf16.msra.mxu1 %v2727_v23 }
0x14b8   :  { %2732 = vmatprep.subr.bf16.mxu1 %v2731_v41 }
0x14bb   :  { %2734 = vmatpush3.bf16.msra.mxu1 %v2731_v41 }
0x14bc   :  { %2736 = vmatprep.subr.bf16.mxu1 %v2735_v30 }
0x14bf   :  { %2738 = vmatpush3.bf16.msra.mxu1 %v2735_v30 }
0x14c0   :  { %2740 = vmatprep.subr.bf16.mxu1 %v2739_v33 }
0x14c3   :  { %2742 = vmatpush3.bf16.msra.mxu1 %v2739_v33 }
0x157f   :  { %v1908_v37 = vpop.f32.mrb[18].mxu0 }
0x1580   :  { %v1912_v57 = vadd.f32 %v1908_v37, %v3151_v4  ;;  %v2544_v39 = vpop.f32.mrb[19].mxu0  ;;  %v2743_v37 = vpack.c.bf16 %v1994_v36, %v1993_v35  ;;  %v2243_v35 = vld [vmem:[%s3554_s9] ss:$0 sm:$0xff] }
0x1581   :  { %v1801_v40 = vpop.f32.mrb[16].mxu1  ;;  %v1995_v39 = vld [vmem:[%s3551_s6 + $0x70] sm:$0xff] }
0x1582   :  { %2899 = vtanh.f32 %v1912_v57  ;;  %v1806_v43 = vrot.slane %v1801_v40, 2  ;;  %v2533_v44 = vpop.f32.mrb[17].mxu1  ;;  %v2241_v9 = vmul.f32 -1.442695, %v1912_v57  ;;  %2744 = vmatprep.subr.bf16.mxu1 %v2743_v37  ;;  %v1952_v57 = vsel %vm1940_vm5, %v3290_v1, %v3249_v16  ;;  %v1996_v40 = vld [vmem:[%s3551_s6 + $0x78] sm:$0xff]  ;;  %s2949_s6 = smov 96  }
0x1583   :  { %2746 = vmatpush3.bf16.msra.mxu1 %v2743_v37  ;;  %v2747_v44 = vpack.c.bf16 %v1996_v40, %v1995_v39 }
0x1584   :  { %v1808_v10 = vadd.f32 %v1806_v43, %v3153_v7 }
0x1585   :  { %2748 = vmatprep.subr.bf16.mxu1 %v2747_v44 }
0x1586   :  { %2901 = vtanh.f32 %v1808_v10  ;;  %v2239_v47 = vmul.f32 -1.442695, %v1808_v10 }
0x1587   :  { %2903 = vpow2.f32 %v2241_v9  ;;  %2750 = vmatpush3.bf16.msra.mxu1 %v2747_v44 }
0x1588   :  { %2905 = vpow2.f32 %v2239_v47 }
0x158c   :  { %v2900_v45 = vpop.eup %2899 }
0x158d   :  { %1925 = vrot.lane.b32.xlu0 %v2900_v45, %s2947_s3  ;;  %v1953_v45 = vsel %vm1942_vm6, %v1952_v57, %v3211_v26 }
0x158e   :  { %v1954_v47 = vsel %vm1944_vm7, %v1953_v45, %v3173_v38 }
0x1590   :  { %v2902_v49 = vpop.eup %2901 }
0x1591   :  { %1821 = vrot.lane.b32.xlu1 %v2902_v49, %s2947_s3  ;;  %v2904_v48 = vpop.eup %2903 }
0x1592   :  { %v1916_v4 = vadd.f32 1.0, %v2904_v48  ;;  %v2906_v51 = vpop.eup %2905 }
0x1593   :  { %v1812_v56 = vadd.f32 1.0, %v2906_v51 }
0x1594   :  { %2907 = vrcp.f32 %v1916_v4 }
0x1595   :  { %2909 = vrcp.f32 %v1812_v56 }
0x159e   :  { %v2908_v58 = vpop.eup %2907 }
0x159f   :  { %v3418_v42 = vpop.eup %2909  ;;  %v1923_v46 = vmul.f32 %v2908_v58, %v1921_v61  ;;  %v2752_v61 = vpack.c.bf16 %v2103_v54, %v2102_v53 }
0x15a0   :  { %v1819_v2 = vmul.f32 %v3418_v42, %v1817_v0  ;;  %v2107_v0 = vld [vmem:[%s3553_s8 + $0x28] sm:$0xff] }
0x15a1   :  { %2753 = vmatpush3.bf16.msra.mxu0 %v2752_v61 }
0x15a2   :  { %2754 = vmatprep.subr.bf16.mxu0 %v2945_v19 }
0x15ff   :  { %v1926_v59 = vpop.permute.xlu0 %1925 }
0x1600   :  { %v1928_v7 = vmul.f32 %v2908_v58, %v1926_v59 }
0x1602   :  { %1930 = vrot.lane.b32.xlu0 %v1928_v7, %s2947_s3 }
0x1603   :  { %v1822_v60 = vpop.permute.xlu1 %1821 }
0x1604   :  { %v1824_v52 = vmul.f32 %v3418_v42, %v1822_v60 }
0x1606   :  { %1826 = vrot.lane.b32.xlu1 %v1824_v52, %s2947_s3 }
0x1674   :  { %v1931_v62 = vpop.permute.xlu0 %1930 }
0x1675   :  { %v1933_v63 = vadd.f32 %v1931_v62, %v1923_v46  ;;  %v2105_v46 = vld [vmem:[%s3553_s8 + $0x18] sm:$0xff] }
0x1677   :  { %2911 = vtanh.f32 %v1933_v63  ;;  %v2106_v63 = vld [vmem:[%s3553_s8 + $0x20] sm:$0xff] }
0x1678   :  { %v1827_v3 = vpop.permute.xlu1 %1826 }
0x1679   :  { %v1829_v5 = vadd.f32 %v1827_v3, %v1819_v2  ;;  %v2758_v2 = vpack.c.bf16 %v2107_v0, %v2106_v63  ;;  %v2108_v3 = vld [vmem:[%s3553_s8 + $0x30] sm:$0xff] }
0x167b   :  { %2913 = vtanh.f32 %v1829_v5  ;;  %v2109_v5 = vld [vmem:[%s3553_s8 + $0x38] sm:$0xff] }
0x1681   :  { %v2912_v8 = vpop.eup %2911 }
0x1682   :  { %1936 = vrot.lane.b32.xlu0 %v2912_v8, %s2947_s3  ;;  %v2761_v8 = vpack.c.bf16 %v2109_v5, %v2108_v3 }
0x1685   :  { %v2914_v22 = vpop.eup %2913 }
0x1686   :  { %1832 = vrot.lane.b32.xlu1 %v2914_v22, %s2947_s3  ;;  %s2950_s3 = smov [#allocation2]  }
0x1687   :  { %s2198_s28 = sshll.u32 %s2950_s3, 4  ;;  %s2199_s28 = int_to_ptr.vmem [resolvable:$true] %s2198_s28 }
0x1688   :  { %s2919_s29 = scalar_lea.vmem %s2199_s28, 32  ;;  %p2924_p1 = scmp.lt.s32.totalorder %s2199_s28, %s2199_s28 }
0x1689   :  { %p2920_p0 = scmp.ne.s32.totalorder %s2199_s28, %s2919_s29  ;;  %p2925_p2 = scmp.lt.s32.totalorder %s2919_s29, %s2919_s29 }
0x168b   :  { %p2926_p3 = por %p2925_p2, %p2924_p1 }
0x168d   :  { %p2927_p4 = pnand %p2926_p3, %p2920_p0 }
0x16f4   :  { %v1937_v43 = vpop.permute.xlu0 %1936 }
0x16f5   :  { %v1939_v10 = vmul.f32 %v2908_v58, %v1937_v43 }
0x16f7   :  { %v1949_v49 = vsel %vm1940_vm5, %v1939_v10, %v3398_v28 }
0x16f8   :  { %v1950_v16 = vsel %vm1942_vm6, %v1949_v49, %v3367_v11  ;;  %v1833_v1 = vpop.permute.xlu1 %1832 }
0x16f9   :  { %v1951_v9 = vsel %vm1944_vm7, %v1950_v16, %v3329_v50  ;;  %v1835_v48 = vmul.f32 %v3418_v42, %v1833_v1 }
0x16fa   :  { %v2777_v4 = vpack.i.bf16 %v1954_v47, %v1951_v9 }
0x16fb   :  { %v1948_v26 = vsel %vm1944_vm7, %v3406_v34, %v1835_v48 }
0x16fc   :  { %2778 = vrot.lane.b32.xlu1 %v2777_v4, %s2949_s6  ;;  %v2772_v28 = vpack.i.bf16 %v1948_v26, %v3296_v6 }
0x16fe   :  { %2773 = vrot.lane.b32.xlu0 %v2772_v28, %s2948_s27 }
0x1702   :  { %2783 = vrot.lane.b32.xlu0 %v2782_v55, %s2948_s27  ;;  %v2104_v55 = vld [vmem:[%s3553_s8 + $0x10] sm:$0xff] }
0x1703   :  { %v2755_v62 = vpack.c.bf16 %v2105_v46, %v2104_v55 }
0x1705   :  { %2756 = vmatpush3.bf16.msra.mxu0 %v2755_v62 }
0x1706   :  { %2757 = vmatprep.subr.bf16.mxu0 %v2945_v19 }
0x1709   :  { %2759 = vmatpush3.bf16.msra.mxu0 %v2758_v2 }
0x170a   :  { %2760 = vmatprep.subr.bf16.mxu0 %v2945_v19 }
0x170d   :  { %2762 = vmatpush3.bf16.msra.mxu0 %v2761_v8 }
0x176e   :  { %v2779_v11 = vpop.permute.xlu1 %2778 }
0x176f   :  { %v2781_v56 = vunpack.i.h.bf16 %v2779_v11  ;;  %v2780_v58 = vunpack.i.l.bf16 %v2779_v11 }
0x1770   :  { %v2774_v50 = vpop.permute.xlu0 %2773 }
0x1771   :  { %v2776_v38 = vunpack.i.h.bf16 %v2774_v50  ;;  %v2775_v51 = vunpack.i.l.bf16 %v2774_v50 }
0x1773   :  { %v1977_v34 = vsel %vm56_vm0, %v2775_v51, %v2780_v58  ;;  %v1978_v6 = vsel %vm56_vm0, %v2776_v38, %v2781_v56 }
0x1774   :  { %v2784_v59 = vpop.permute.xlu0 %2783 }
0x1775   :  { %v2786_v7 = vunpack.i.h.bf16 %v2784_v59  ;;  %v2785_v42 = vunpack.i.l.bf16 %v2784_v59 }
0x1777   :  { %v1979_v60 = vsel %vm166_vm4, %v1977_v34, %v2785_v42  ;;  %v1980_v52 = vsel %vm166_vm4, %v1978_v6, %v2786_v7 }
0x1778   :  { %2577 = vmatprep.mubr.f32.mxu1 %v1979_v60 }
0x1779   :  { %2578 = vmatmul.mubr.f32.vlgmr.msra.gmra.mrb[18].mxu1 %v1980_v52 }
0x184c   :  { %v2579_v13 = vpop.f32.mrb[18].mxu1 }
0x184d   :  { %v2070_v14 = vpop.f32.mrb[19].mxu1  ;;  %v2076_v17 = vadd.f32 %v2579_v13, %v2242_v12 }
0x184e   :  { %v2071_v15 = vadd.f32 %v2242_v12, %v2070_v14 }
0x1850   :  { %2915 = vtanh.f32 %v2071_v15 }
0x1851   :  { %2917 = vtanh.f32 %v2076_v17 }
0x185a   :  { %v2916_v18 = vpop.eup %2915 }
0x185b   :  { %v2082_v20 = vrot.slane %v2916_v18, 2  ;;  %v2085_v22 = vrot.slane %v2916_v18, 4  ;;  %v2088_v24 = vrot.slane %v2916_v18, 6  ;;  %v2918_v25 = vpop.eup %2917 }
0x185c   :  { %v2093_v27 = vrot.slane %v2918_v25, 2  ;;  %v2096_v30 = vrot.slane %v2918_v25, 4  ;;  %v2099_v32 = vrot.slane %v2918_v25, 6 }
0x185d   :  { %v2084_v21 = vmax.f32 %v2916_v18, %v2082_v20 }
0x185f   :  { %v2087_v23 = vmax.f32 %v2084_v21, %v2085_v22 }
0x1861   :  { %v2090_v41 = vmax.f32 %v2087_v23, %v2088_v24 }
0x1863   :  { %v2091_v19 = vmax.f32 %v2090_v41, %v2918_v25 }
0x1865   :  { %v2095_v29 = vmax.f32 %v2091_v19, %v2093_v27 }
0x1867   :  { %v2098_v31 = vmax.f32 %v2095_v29, %v2096_v30 }
0x1869   :  { %v2101_v33 = vmax.f32 %v2098_v31, %v2099_v32 }
0x186b   :  { %2597 = vmatmul.mubr.msk.f32.vlgmr.msra.gmra.mrb[20].mxu0 %vm166_vm4, %v2101_v33 }
0x193e   :  { %v2186_v36 = vpop.f32.mrb[20].mxu0 }
0x193f   :  { %v2187_v37 = vadd.f32 %v2243_v35, %v2186_v36  ;;  %v2598_v57 = vpop.f32.mrb[21].mxu0 }
0x1941   :  { %2191 = vst.msk [vmem:[#allocation2] sm:$0x3] %vm2190_vm8, %v2187_v37 }
0x1942   :  { %2930 = shalt.err (!%p2927_p4)
}
0x1943   :  { %s2931_s11 = scalar_lea.hbm %s3555_s10, 32 }
0x1944   :  { %p2932_p5 = scmp.ne.s32.totalorder %s3555_s10, %s2931_s11  ;;  %p2935_p6 = scmp.lt.u32.totalorder %s2931_s11, %s3555_s10 }
0x1946   :  { %p2937_p7 = pnand %p2935_p6, %p2932_p5 }
0x1948   :  { %2940 = shalt.err (!%p2937_p7)
}
0x1949   :  { %2201 = dma.vmem_to_hbm [thread:$0]  %s2199_s28, 32, %s3555_s10, [#allocation3]  }
0x194a   :  { %2941 = dma.done.wait [#allocation3], 32  }
0x194b   :  { %2942 = vsyncadd [#allocation3], 4294967264 }
0x194c   :  { %2205 = vsyncpa [#allocation3], 1 }

</bundles_post_ra>
